<compile_context>
chip_gen: v7x
topology: tpu7x:2x2x1
jax: 0.10.0
libtpu: 0.0.40
codegen_flags: <defaults>
</compile_context>

<pallas_src>
import functools

import jax
import jax.numpy as jnp
from jax import lax
from jax.experimental import pallas as pl
from jax.experimental.pallas import tpu as pltpu


def auto_padding(kernel_size, padding=None):
    if padding is None:
        padding = (kernel_size // 2 if isinstance(kernel_size, int)
                   else tuple(ks // 2 for ks in kernel_size))
    return padding


def _pair(v):
    return (v, v) if isinstance(v, int) else tuple(v)


def _conv_kernel(x_ref, w_ref, ss_ref, o_ref, *, kh_size, kw_size,
                 stride_h, stride_w, h_out, w_out, act):
    """Fused Conv2d + per-channel scale/shift (+ activation), one batch element.

    x_ref : (H_pad, W_pad, C_in)        padded NHWC input slab (VMEM)
    w_ref : (KH*KW, C_in, C_out)        weights (block-diagonal if grouped)
    ss_ref: (2, C_out)                  row 0 = scale, row 1 = shift
    o_ref : (H_out*W_out, C_out)        lane-dense output slab
    """
    hw = h_out * w_out
    c_in = x_ref.shape[-1]
    c_out = o_ref.shape[-1]

    acc = jnp.zeros((hw, c_out), jnp.float32)
    for kh in range(kh_size):
        row_sl = (pl.ds(kh, h_out) if stride_h == 1
                  else pl.ds(kh, h_out, stride_h))
        for kw in range(kw_size):
            col_sl = (pl.ds(kw, w_out) if stride_w == 1
                      else pl.ds(kw, w_out, stride_w))
            patch = x_ref[row_sl, col_sl, :]                 # (h_out, w_out, C_in)
            patch2d = patch.reshape(hw, c_in)
            acc += jnp.dot(patch2d, w_ref[kh * kw_size + kw],
                           preferred_element_type=jnp.float32)

    # Folded bias / BatchNorm: per-channel affine, broadcast over all rows.
    scale = ss_ref[0:1, :].astype(jnp.float32)               # (1, C_out)
    shift = ss_ref[1:2, :].astype(jnp.float32)
    y = acc * scale + shift

    if act in ("ReLU", "ReLU-inplace"):
        y = jnp.maximum(y, 0.0)
    elif act == "SiLU":
        y = y * jax.nn.sigmoid(y)

    o_ref[...] = y.astype(o_ref.dtype)


@functools.partial(jax.jit,
                   static_argnames=("stride", "padding", "groups", "act", "eps"))
def conv2d_forward(x, weight, bias=None, *, stride=1, padding=None, groups=1,
                   bn_params=None, act=None, eps=1e-5):
    """Pallas forward of Conv: y = act(BN(conv2d(x, W) + bias)).

    x        : (B, C_in, H, W) NCHW (PyTorch layout)
    weight   : (C_out, C_in // groups, KH, KW)
    bias     : (C_out,) or None
    bn_params: None or (gamma, beta, running_mean, running_var) [inference stats]
    act      : None | 'ReLU' | 'ReLU-inplace' | 'SiLU'
    """
    B, C_in, H, W = x.shape
    C_out, C_in_pg, KH, KW = weight.shape
    assert C_in_pg * groups == C_in and C_out % groups == 0

    sh, sw = _pair(stride)
    if padding is None:
        ph, pw = KH // 2, KW // 2
    else:
        ph, pw = _pair(padding)
    h_out = (H + 2 * ph - KH) // sh + 1
    w_out = (W + 2 * pw - KW) // sw + 1

    # NCHW -> NHWC (channels on the lane axis), zero-pad spatially on host.
    x_nhwc = jnp.transpose(x, (0, 2, 3, 1))
    x_pad = jnp.pad(x_nhwc, ((0, 0), (ph, ph), (pw, pw), (0, 0)))
    Hp, Wp = H + 2 * ph, W + 2 * pw

    # (C_out, C_in_pg, KH, KW) -> (KH*KW, C_in_pg, C_out)
    w_r = jnp.transpose(weight, (2, 3, 1, 0)).reshape(KH * KW, C_in_pg, C_out)
    if groups == 1:
        w_full = w_r                                          # (KH*KW, C_in, C_out)
    else:
        # Embed grouped weights as block-diagonal (KH*KW, C_in, C_out) so the
        # kernel needs no lane sub-slicing.  (Costs x`groups` MXU FLOPs.)
        c_out_pg = C_out // groups
        gi = jnp.arange(C_in) // C_in_pg                      # group of each in-ch
        go = jnp.arange(C_out) // c_out_pg                    # group of each out-ch
        mask = (gi[:, None] == go[None, :]).astype(w_r.dtype) # (C_in, C_out)
        w_full = w_r[:, jnp.arange(C_in) % C_in_pg, :] * mask[None, :, :]

    # Fold bias + BatchNorm running stats into a per-channel scale / shift.
    scale = jnp.ones((C_out,), jnp.float32)
    shift = (jnp.zeros((C_out,), jnp.float32) if bias is None
             else bias.astype(jnp.float32))
    if bn_params is not None:
        gamma, beta, mean, var = (p.astype(jnp.float32) for p in bn_params)
        bn_scale = gamma * lax.rsqrt(var + eps)
        shift = (shift - mean) * bn_scale + beta
        scale = scale * bn_scale
    ss = jnp.stack([scale, shift])                            # (2, C_out)

    kernel = functools.partial(
        _conv_kernel, kh_size=KH, kw_size=KW, stride_h=sh, stride_w=sw,
        h_out=h_out, w_out=w_out, act=act)

    out = pl.pallas_call(
        kernel,
        out_shape=jax.ShapeDtypeStruct((B, h_out * w_out, C_out), x.dtype),
        grid=(B,),
        in_specs=[
            pl.BlockSpec((None, Hp, Wp, C_in), lambda b: (b, 0, 0, 0)),
            pl.BlockSpec((KH * KW, C_in, C_out), lambda b: (0, 0, 0)),
            pl.BlockSpec((2, C_out), lambda b: (0, 0)),
        ],
        out_specs=pl.BlockSpec((None, h_out * w_out, C_out), lambda b: (b, 0, 0)),
        compiler_params=pltpu.CompilerParams(
            dimension_semantics=("parallel",)),
    )(x_pad, w_full, ss)

    # (B, H_out*W_out, C_out) -> NCHW
    return jnp.transpose(out.reshape(B, h_out, w_out, C_out), (0, 3, 1, 2))


class Conv:
    """JAX/Pallas mirror of models.common.Conv (forward pass)."""

    def __init__(self, input_channels, output_channels, kernel_size, stride,
                 padding=None, groups=1, bias=True, bn=False, act=None, *, key):
        kh, kw = _pair(kernel_size)
        self.stride = stride
        self.padding = auto_padding(kernel_size, padding)
        self.groups = groups
        self.act = act
        k_w, k_b, k_m, k_v = jax.random.split(key, 4)
        fan_in = (input_channels // groups) * kh * kw
        bound = 1.0 / (fan_in ** 0.5)
        self.weight = jax.random.uniform(
            k_w, (output_channels, input_channels // groups, kh, kw),
            jnp.float32, -bound, bound)
        self.bias = (jax.random.uniform(k_b, (output_channels,), jnp.float32,
                                        -bound, bound) if bias else None)
        if bn:
            # TODO(synk): training-mode BatchNorm2d (batch statistics) needs a
            # cross-batch reduction pass; we fold inference running stats instead.
            self.bn_params = (
                jnp.ones((output_channels,), jnp.float32),                             # gamma
                jnp.zeros((output_channels,), jnp.float32),                            # beta
                0.1 * jax.random.normal(k_m, (output_channels,), jnp.float32),         # running_mean
                1.0 + 0.1 * jax.random.uniform(k_v, (output_channels,), jnp.float32),  # running_var
            )
        else:
            self.bn_params = None

    def __call__(self, x):
        return conv2d_forward(x, self.weight, self.bias, stride=self.stride,
                              padding=self.padding, groups=self.groups,
                              bn_params=self.bn_params, act=self.act)


def _reference_conv(x, weight, bias, *, stride, padding, groups, bn_params,
                    act, eps=1e-5):
    """Pure-JAX (XLA) reference for validation."""
    sh, sw = _pair(stride)
    if padding is None:
        ph, pw = weight.shape[2] // 2, weight.shape[3] // 2
    else:
        ph, pw = _pair(padding)
    y = lax.conv_general_dilated(
        x, weight, window_strides=(sh, sw), padding=((ph, ph), (pw, pw)),
        dimension_numbers=("NCHW", "OIHW", "NCHW"), feature_group_count=groups)
    if bias is not None:
        y = y + bias[None, :, None, None]
    if bn_params is not None:
        gamma, beta, mean, var = bn_params
        y = ((y - mean[None, :, None, None])
             * (gamma / jnp.sqrt(var + eps))[None, :, None, None]
             + beta[None, :, None, None])
    if act in ("ReLU", "ReLU-inplace"):
        y = jnp.maximum(y, 0.0)
    elif act == "SiLU":
        y = y * jax.nn.sigmoid(y)
    return y


if __name__ == "__main__":
    key = jax.random.PRNGKey(0)
    k_x, k_m1, k_m2, k_m3 = jax.random.split(key, 4)

    B, C_in, H, W = 2, 4, 16, 16
    x = jax.random.normal(k_x, (B, C_in, H, W), jnp.float32)

    # Case 1: Conv(4 -> 8, k=3, s=1, auto pad) + bias + ReLU.
    m1 = Conv(C_in, 8, 3, 1, bias=True, bn=False, act="ReLU", key=k_m1)
    out1 = jax.block_until_ready(m1(x))
    ref1 = _reference_conv(x, m1.weight, m1.bias, stride=1, padding=m1.padding,
                           groups=1, bn_params=None, act="ReLU")
    assert out1.shape == (B, 8, H, W)
    assert jnp.allclose(out1, ref1, atol=1e-2, rtol=1e-2), "Conv+ReLU mismatch"

    # Case 2: Conv(4 -> 8, k=3, s=1) + bias + BatchNorm (running stats) + SiLU.
    m2 = Conv(C_in, 8, 3, 1, bias=True, bn=True, act="SiLU", key=k_m2)
    out2 = jax.block_until_ready(m2(x))
    ref2 = _reference_conv(x, m2.weight, m2.bias, stride=1, padding=m2.padding,
                           groups=1, bn_params=m2.bn_params, act="SiLU")
    assert jnp.allclose(out2, ref2, atol=1e-2, rtol=1e-2), "Conv+BN+SiLU mismatch"

    # Case 3: grouped Conv(4 -> 8, k=1, s=1, groups=2) + bias, no activation.
    m3 = Conv(C_in, 8, 1, 1, groups=2, bias=True, bn=False, act=None, key=k_m3)
    out3 = jax.block_until_ready(m3(x))
    ref3 = _reference_conv(x, m3.weight, m3.bias, stride=1, padding=m3.padding,
                           groups=2, bn_params=None, act=None)
    assert out3.shape == (B, 8, H, W)
    assert jnp.allclose(out3, ref3, atol=1e-2, rtol=1e-2), "grouped Conv mismatch"

    print("KERNEL_OK")
</pallas_src>

<mosaic_0001>
module attributes {stable_mosaic.version = 11 : i64} {
  func.func @_conv_kernel(%arg0: i32, %arg1: memref<1x18x18x4xf32, #tpu.memory_space<vmem>>, %arg2: memref<9x4x8xf32, #tpu.memory_space<vmem>>, %arg3: memref<2x8xf32, #tpu.memory_space<vmem>>, %arg4: memref<1x256x8xf32, #tpu.memory_space<vmem>>) attributes {dimension_semantics = [#tpu.dimension_semantics<parallel>], iteration_bounds = array<i64: 2>, scalar_prefetch = 0 : i64, scratch_operands = 0 : i64, tpu.core_type = #tpu.core_type<tc>, window_params = [{transform_indices = @transform_0, window_bounds = array<i64: 1, 18, 18, 4>}, {pipeline_mode = #tpu.pipeline_mode<synchronous>, transform_indices = @transform_1, window_bounds = array<i64: 9, 4, 8>}, {pipeline_mode = #tpu.pipeline_mode<synchronous>, transform_indices = @transform_2, window_bounds = array<i64: 2, 8>}, {transform_indices = @transform_3, window_bounds = array<i64: 1, 256, 8>}]} {
    %cst = arith.constant 0.000000e+00 : f32
    %0 = vector.broadcast %cst : f32 to vector<256x8xf32>
    %c0 = arith.constant 0 : index
    %c0_0 = arith.constant 0 : index
    %c0_1 = arith.constant 0 : index
    %c0_2 = arith.constant 0 : index
    %1 = vector.load %arg1[%c0, %c0_0, %c0_1, %c0_2] : memref<1x18x18x4xf32, #tpu.memory_space<vmem>>, vector<1x16x16x4xf32>
    %2 = vector.shape_cast %1 : vector<1x16x16x4xf32> to vector<16x16x4xf32>
    %3 = vector.shape_cast %2 : vector<16x16x4xf32> to vector<256x4xf32>
    %c0_3 = arith.constant 0 : index
    %c0_4 = arith.constant 0 : index
    %c0_5 = arith.constant 0 : index
    %4 = vector.load %arg2[%c0_3, %c0_4, %c0_5] : memref<9x4x8xf32, #tpu.memory_space<vmem>>, vector<1x4x8xf32>
    %5 = vector.shape_cast %4 : vector<1x4x8xf32> to vector<4x8xf32>
    %cst_6 = arith.constant dense<0.000000e+00> : vector<256x8xf32>
    %6 = tpu.matmul %3, %5, %cst_6 {dimension_numbers = #tpu.dot_dimension_numbers<[1], [0], [0], [1], [0, 0, 1, 1], [], []>} : vector<256x4xf32>, vector<4x8xf32>, vector<256x8xf32> -> vector<256x8xf32>
    %7 = arith.addf %0, %6 : vector<256x8xf32>
    %c0_7 = arith.constant 0 : index
    %c0_8 = arith.constant 0 : index
    %c1 = arith.constant 1 : index
    %c0_9 = arith.constant 0 : index
    %8 = vector.load %arg1[%c0_7, %c0_8, %c1, %c0_9] : memref<1x18x18x4xf32, #tpu.memory_space<vmem>>, vector<1x16x16x4xf32>
    %9 = vector.shape_cast %8 : vector<1x16x16x4xf32> to vector<16x16x4xf32>
    %10 = vector.shape_cast %9 : vector<16x16x4xf32> to vector<256x4xf32>
    %c1_10 = arith.constant 1 : index
    %c0_11 = arith.constant 0 : index
    %c0_12 = arith.constant 0 : index
    %11 = vector.load %arg2[%c1_10, %c0_11, %c0_12] : memref<9x4x8xf32, #tpu.memory_space<vmem>>, vector<1x4x8xf32>
    %12 = vector.shape_cast %11 : vector<1x4x8xf32> to vector<4x8xf32>
    %cst_13 = arith.constant dense<0.000000e+00> : vector<256x8xf32>
    %13 = tpu.matmul %10, %12, %cst_13 {dimension_numbers = #tpu.dot_dimension_numbers<[1], [0], [0], [1], [0, 0, 1, 1], [], []>} : vector<256x4xf32>, vector<4x8xf32>, vector<256x8xf32> -> vector<256x8xf32>
    %14 = arith.addf %7, %13 : vector<256x8xf32>
    %c0_14 = arith.constant 0 : index
    %c0_15 = arith.constant 0 : index
    %c2 = arith.constant 2 : index
    %c0_16 = arith.constant 0 : index
    %15 = vector.load %arg1[%c0_14, %c0_15, %c2, %c0_16] : memref<1x18x18x4xf32, #tpu.memory_space<vmem>>, vector<1x16x16x4xf32>
    %16 = vector.shape_cast %15 : vector<1x16x16x4xf32> to vector<16x16x4xf32>
    %17 = vector.shape_cast %16 : vector<16x16x4xf32> to vector<256x4xf32>
    %c2_17 = arith.constant 2 : index
    %c0_18 = arith.constant 0 : index
    %c0_19 = arith.constant 0 : index
    %18 = vector.load %arg2[%c2_17, %c0_18, %c0_19] : memref<9x4x8xf32, #tpu.memory_space<vmem>>, vector<1x4x8xf32>
    %19 = vector.shape_cast %18 : vector<1x4x8xf32> to vector<4x8xf32>
    %cst_20 = arith.constant dense<0.000000e+00> : vector<256x8xf32>
    %20 = tpu.matmul %17, %19, %cst_20 {dimension_numbers = #tpu.dot_dimension_numbers<[1], [0], [0], [1], [0, 0, 1, 1], [], []>} : vector<256x4xf32>, vector<4x8xf32>, vector<256x8xf32> -> vector<256x8xf32>
    %21 = arith.addf %14, %20 : vector<256x8xf32>
    %c0_21 = arith.constant 0 : index
    %c1_22 = arith.constant 1 : index
    %c0_23 = arith.constant 0 : index
    %c0_24 = arith.constant 0 : index
    %22 = vector.load %arg1[%c0_21, %c1_22, %c0_23, %c0_24] : memref<1x18x18x4xf32, #tpu.memory_space<vmem>>, vector<1x16x16x4xf32>
    %23 = vector.shape_cast %22 : vector<1x16x16x4xf32> to vector<16x16x4xf32>
    %24 = vector.shape_cast %23 : vector<16x16x4xf32> to vector<256x4xf32>
    %c3 = arith.constant 3 : index
    %c0_25 = arith.constant 0 : index
    %c0_26 = arith.constant 0 : index
    %25 = vector.load %arg2[%c3, %c0_25, %c0_26] : memref<9x4x8xf32, #tpu.memory_space<vmem>>, vector<1x4x8xf32>
    %26 = vector.shape_cast %25 : vector<1x4x8xf32> to vector<4x8xf32>
    %cst_27 = arith.constant dense<0.000000e+00> : vector<256x8xf32>
    %27 = tpu.matmul %24, %26, %cst_27 {dimension_numbers = #tpu.dot_dimension_numbers<[1], [0], [0], [1], [0, 0, 1, 1], [], []>} : vector<256x4xf32>, vector<4x8xf32>, vector<256x8xf32> -> vector<256x8xf32>
    %28 = arith.addf %21, %27 : vector<256x8xf32>
    %c0_28 = arith.constant 0 : index
    %c1_29 = arith.constant 1 : index
    %c1_30 = arith.constant 1 : index
    %c0_31 = arith.constant 0 : index
    %29 = vector.load %arg1[%c0_28, %c1_29, %c1_30, %c0_31] : memref<1x18x18x4xf32, #tpu.memory_space<vmem>>, vector<1x16x16x4xf32>
    %30 = vector.shape_cast %29 : vector<1x16x16x4xf32> to vector<16x16x4xf32>
    %31 = vector.shape_cast %30 : vector<16x16x4xf32> to vector<256x4xf32>
    %c4 = arith.constant 4 : index
    %c0_32 = arith.constant 0 : index
    %c0_33 = arith.constant 0 : index
    %32 = vector.load %arg2[%c4, %c0_32, %c0_33] : memref<9x4x8xf32, #tpu.memory_space<vmem>>, vector<1x4x8xf32>
    %33 = vector.shape_cast %32 : vector<1x4x8xf32> to vector<4x8xf32>
    %cst_34 = arith.constant dense<0.000000e+00> : vector<256x8xf32>
    %34 = tpu.matmul %31, %33, %cst_34 {dimension_numbers = #tpu.dot_dimension_numbers<[1], [0], [0], [1], [0, 0, 1, 1], [], []>} : vector<256x4xf32>, vector<4x8xf32>, vector<256x8xf32> -> vector<256x8xf32>
    %35 = arith.addf %28, %34 : vector<256x8xf32>
    %c0_35 = arith.constant 0 : index
    %c1_36 = arith.constant 1 : index
    %c2_37 = arith.constant 2 : index
    %c0_38 = arith.constant 0 : index
    %36 = vector.load %arg1[%c0_35, %c1_36, %c2_37, %c0_38] : memref<1x18x18x4xf32, #tpu.memory_space<vmem>>, vector<1x16x16x4xf32>
    %37 = vector.shape_cast %36 : vector<1x16x16x4xf32> to vector<16x16x4xf32>
    %38 = vector.shape_cast %37 : vector<16x16x4xf32> to vector<256x4xf32>
    %c5 = arith.constant 5 : index
    %c0_39 = arith.constant 0 : index
    %c0_40 = arith.constant 0 : index
    %39 = vector.load %arg2[%c5, %c0_39, %c0_40] : memref<9x4x8xf32, #tpu.memory_space<vmem>>, vector<1x4x8xf32>
    %40 = vector.shape_cast %39 : vector<1x4x8xf32> to vector<4x8xf32>
    %cst_41 = arith.constant dense<0.000000e+00> : vector<256x8xf32>
    %41 = tpu.matmul %38, %40, %cst_41 {dimension_numbers = #tpu.dot_dimension_numbers<[1], [0], [0], [1], [0, 0, 1, 1], [], []>} : vector<256x4xf32>, vector<4x8xf32>, vector<256x8xf32> -> vector<256x8xf32>
    %42 = arith.addf %35, %41 : vector<256x8xf32>
    %c0_42 = arith.constant 0 : index
    %c2_43 = arith.constant 2 : index
    %c0_44 = arith.constant 0 : index
    %c0_45 = arith.constant 0 : index
    %43 = vector.load %arg1[%c0_42, %c2_43, %c0_44, %c0_45] : memref<1x18x18x4xf32, #tpu.memory_space<vmem>>, vector<1x16x16x4xf32>
    %44 = vector.shape_cast %43 : vector<1x16x16x4xf32> to vector<16x16x4xf32>
    %45 = vector.shape_cast %44 : vector<16x16x4xf32> to vector<256x4xf32>
    %c6 = arith.constant 6 : index
    %c0_46 = arith.constant 0 : index
    %c0_47 = arith.constant 0 : index
    %46 = vector.load %arg2[%c6, %c0_46, %c0_47] : memref<9x4x8xf32, #tpu.memory_space<vmem>>, vector<1x4x8xf32>
    %47 = vector.shape_cast %46 : vector<1x4x8xf32> to vector<4x8xf32>
    %cst_48 = arith.constant dense<0.000000e+00> : vector<256x8xf32>
    %48 = tpu.matmul %45, %47, %cst_48 {dimension_numbers = #tpu.dot_dimension_numbers<[1], [0], [0], [1], [0, 0, 1, 1], [], []>} : vector<256x4xf32>, vector<4x8xf32>, vector<256x8xf32> -> vector<256x8xf32>
    %49 = arith.addf %42, %48 : vector<256x8xf32>
    %c0_49 = arith.constant 0 : index
    %c2_50 = arith.constant 2 : index
    %c1_51 = arith.constant 1 : index
    %c0_52 = arith.constant 0 : index
    %50 = vector.load %arg1[%c0_49, %c2_50, %c1_51, %c0_52] : memref<1x18x18x4xf32, #tpu.memory_space<vmem>>, vector<1x16x16x4xf32>
    %51 = vector.shape_cast %50 : vector<1x16x16x4xf32> to vector<16x16x4xf32>
    %52 = vector.shape_cast %51 : vector<16x16x4xf32> to vector<256x4xf32>
    %c7 = arith.constant 7 : index
    %c0_53 = arith.constant 0 : index
    %c0_54 = arith.constant 0 : index
    %53 = vector.load %arg2[%c7, %c0_53, %c0_54] : memref<9x4x8xf32, #tpu.memory_space<vmem>>, vector<1x4x8xf32>
    %54 = vector.shape_cast %53 : vector<1x4x8xf32> to vector<4x8xf32>
    %cst_55 = arith.constant dense<0.000000e+00> : vector<256x8xf32>
    %55 = tpu.matmul %52, %54, %cst_55 {dimension_numbers = #tpu.dot_dimension_numbers<[1], [0], [0], [1], [0, 0, 1, 1], [], []>} : vector<256x4xf32>, vector<4x8xf32>, vector<256x8xf32> -> vector<256x8xf32>
    %56 = arith.addf %49, %55 : vector<256x8xf32>
    %c0_56 = arith.constant 0 : index
    %c2_57 = arith.constant 2 : index
    %c2_58 = arith.constant 2 : index
    %c0_59 = arith.constant 0 : index
    %57 = vector.load %arg1[%c0_56, %c2_57, %c2_58, %c0_59] : memref<1x18x18x4xf32, #tpu.memory_space<vmem>>, vector<1x16x16x4xf32>
    %58 = vector.shape_cast %57 : vector<1x16x16x4xf32> to vector<16x16x4xf32>
    %59 = vector.shape_cast %58 : vector<16x16x4xf32> to vector<256x4xf32>
    %c8 = arith.constant 8 : index
    %c0_60 = arith.constant 0 : index
    %c0_61 = arith.constant 0 : index
    %60 = vector.load %arg2[%c8, %c0_60, %c0_61] : memref<9x4x8xf32, #tpu.memory_space<vmem>>, vector<1x4x8xf32>
    %61 = vector.shape_cast %60 : vector<1x4x8xf32> to vector<4x8xf32>
    %cst_62 = arith.constant dense<0.000000e+00> : vector<256x8xf32>
    %62 = tpu.matmul %59, %61, %cst_62 {dimension_numbers = #tpu.dot_dimension_numbers<[1], [0], [0], [1], [0, 0, 1, 1], [], []>} : vector<256x4xf32>, vector<4x8xf32>, vector<256x8xf32> -> vector<256x8xf32>
    %63 = arith.addf %56, %62 : vector<256x8xf32>
    %c0_63 = arith.constant 0 : index
    %c0_64 = arith.constant 0 : index
    %64 = vector.load %arg3[%c0_63, %c0_64] : memref<2x8xf32, #tpu.memory_space<vmem>>, vector<1x8xf32>
    %c1_65 = arith.constant 1 : index
    %c0_66 = arith.constant 0 : index
    %65 = vector.load %arg3[%c1_65, %c0_66] : memref<2x8xf32, #tpu.memory_space<vmem>>, vector<1x8xf32>
    %66 = vector.broadcast %64 : vector<1x8xf32> to vector<256x8xf32>
    %67 = arith.mulf %63, %66 : vector<256x8xf32>
    %68 = vector.broadcast %65 : vector<1x8xf32> to vector<256x8xf32>
    %69 = arith.addf %67, %68 : vector<256x8xf32>
    %cst_67 = arith.constant 0.000000e+00 : f32
    %70 = vector.broadcast %cst_67 : f32 to vector<256x8xf32>
    %71 = arith.maximumf %69, %70 : vector<256x8xf32>
    %c0_68 = arith.constant 0 : index
    %c0_69 = arith.constant 0 : index
    %c0_70 = arith.constant 0 : index
    %72 = vector.load %arg4[%c0_68, %c0_69, %c0_70] : memref<1x256x8xf32, #tpu.memory_space<vmem>>, vector<1x256x8xf32>
    %73 = vector.shape_cast %72 : vector<1x256x8xf32> to vector<256x8xf32>
    %74 = vector.shape_cast %71 : vector<256x8xf32> to vector<1x256x8xf32>
    tpu.vector_store %arg4[%c0_68, %c0_69, %c0_70], %74 {strides = array<i32>} : memref<1x256x8xf32, #tpu.memory_space<vmem>>, vector<1x256x8xf32>,
    return
  }
  func.func @transform_0(%arg0: i32) -> (i32, i32, i32, i32) {
    %c0_i32 = arith.constant 0 : i32
    %c0_i32_0 = arith.constant 0 : i32
    %c0_i32_1 = arith.constant 0 : i32
    %c0_i32_2 = arith.constant 0 : i32
    return %arg0, %c0_i32, %c0_i32_0, %c0_i32_1 : i32, i32, i32, i32
  }
  func.func @transform_1(%arg0: i32) -> (i32, i32, i32) {
    %c0_i32 = arith.constant 0 : i32
    %c0_i32_0 = arith.constant 0 : i32
    %c0_i32_1 = arith.constant 0 : i32
    %c0_i32_2 = arith.constant 0 : i32
    return %c0_i32, %c0_i32_0, %c0_i32_1 : i32, i32, i32
  }
  func.func @transform_2(%arg0: i32) -> (i32, i32) {
    %c0_i32 = arith.constant 0 : i32
    %c0_i32_0 = arith.constant 0 : i32
    %c0_i32_1 = arith.constant 0 : i32
    return %c0_i32, %c0_i32_0 : i32, i32
  }
  func.func @transform_3(%arg0: i32) -> (i32, i32, i32) {
    %c0_i32 = arith.constant 0 : i32
    %c0_i32_0 = arith.constant 0 : i32
    %c0_i32_1 = arith.constant 0 : i32
    return %arg0, %c0_i32, %c0_i32_0 : i32, i32, i32
  }
}

</mosaic_0001>

<bundles_post_ra>
// kernel: conv2d_forward.1
= control target key start
LH: loop header
LB: loop body
LE: loop exit
PB: predicated region body
PF: predicated region fallthrough
CT: control target
= control target key end

     0   :  { %s5366_s12 = smov 0   ;;  %s6472_s0 = inlined_call_operand.vmem [shape: f32[2,18,18,4], index: 0, kind: input, shape index: {}]   ;;  %s6473_s1 = inlined_call_operand.vmem [shape: f32[9,4,8], index: 1, kind: input, shape index: {}]   ;;  %s6474_s2 = inlined_call_operand.vmem [shape: f32[2,8], index: 2, kind: input, shape index: {}]   ;;  %s6475_s3 = inlined_call_operand.vmem [shape: f32[2,256,8], index: 3, kind: output, shape index: {}]  }
   0x1 LB: > { %s3814_s13 = sadd.s32 4294967295, %s5344_s12   ;;  %p3818_p0 = scmp.ge.s32.totalorder %s5344_s12, 1  ;;  %s5344_s12 = sphi %s5366_s12, %s13_s12  }
   0x2   : > { %p137_p1 = scmp.lt.s32.totalorder %s5344_s12, 3 }
   0x4   : > { %p138_p2 = pnand %p3818_p0, %p137_p1 }
   0x6   : > { %141 = sbr.rel (%p138_p2) target bundleno = 527 (0x20f), region = 32 }
   0xd   : > { %v3822_v0 = vld [vmem:[%s6473_s1 + $0x4] sm:$0xf]  ;;  %vm335_vm0 = vcmask 1043456   ;;  %v5380_v1 = vld [vmem:[%s6473_s1 + $0x10] sm:$0xf]  ;;  %p161_p3 = scmp.lt.s32.totalorder %s3814_s13, 1 }
   0xe   : > { %4621 = vmatprep.subr.msk.mxu1 %vm335_vm0, %v3822_v0  ;;  %4821 = vmatprep.subr.msk.mxu0 %vm335_vm0, %v5380_v1  ;;  %v203_v2 = vld [vmem:[%s6473_s1] sm:$0xf]  ;;  %v4087_v3 = vld [vmem:[%s6473_s1 + $0x14] sm:$0xf]  ;;  %vm238_vm1 = vcmask 31744   ;;  %vm3726_vm2 = vcmask 64512  }
   0xf   : > { %4622 = vmatpush3.msk.msra.mxu1 %vm335_vm0, %v3822_v0  ;;  %4822 = vmatpush3.msk.msra.mxu0 %vm335_vm0, %v5380_v1  ;;  %s6586_s13 = smov (!%p161_p3, %s3814_s13), 1  ;;  %v4153_v9 = vld [vmem:[%s6473_s1 + $0x18] sm:$0xf]  ;;  %v5421_v10 = vld [vmem:[%s6473_s1 + $0x8] sm:$0xf] }
  0x10   : > { %4671 = vmatprep.subr.msk.mxu1 %vm335_vm0, %v203_v2  ;;  %4871 = vmatprep.subr.msk.mxu0 %vm335_vm0, %v4087_v3  ;;  %s5329_s22 = smul.u32 432, %s6586_s13  ;;  %v5540_v28 = vld [vmem:[%s6473_s1 + $0x1c] sm:$0xf]  ;;  %v5703_v61 = vld [vmem:[%s6473_s1 + $0xc] sm:$0xf]  ;;  %s4323_s15 = sshll.u32 %s6586_s13, 8 }
  0x11   : > { %s6336_s18 = scalar_lea.vmem %s6475_s3, %s4323_s15 }
  0x12   : > { %s5402_s25 = scalar_lea.vmem %s6472_s0, %s5329_s22 }
  0x13   : > { %v204_v4 = vld [vmem:[%s5402_s25 + $0x1] sm:$0xff]  ;;  %v3989_v5 = vld [vmem:[%s5402_s25 + $0x19] sm:$0xff]  ;;  %v205_v6 = vld [vmem:[%s5402_s25 + $0x9] sm:$0xff] }
  0x14   : > { %4623 = vmatprep.mubr.msk.f32.mxu1 %vm238_vm1, %v204_v4  ;;  %4823 = vmatprep.mubr.msk.f32.mxu0 %vm238_vm1, %v3989_v5  ;;  %v3990_v7 = vld [vmem:[%s5402_s25 + $0x21] sm:$0xff]  ;;  %v5411_v8 = vld [vmem:[%s5402_s25 + $0x31] sm:$0xff]  ;;  %v5426_v11 = vld [vmem:[%s5402_s25 + $0x39] sm:$0xff] }
  0x15   : > { %4624 = vmatmul.mubr.msk.f32.vlgmr.msra.gmra.mrb[0].mxu1 %vm238_vm1, %v205_v6  ;;  %4824 = vmatmul.mubr.msk.f32.vlgmr.msra.gmra.mrb[0].mxu0 %vm238_vm1, %v3990_v7  ;;  %v5432_v12 = vld [vmem:[%s5402_s25 + $0x49] sm:$0xff]  ;;  %v5445_v13 = vld [vmem:[%s5402_s25 + $0x51] sm:$0xff]  ;;  %v5448_v14 = vld [vmem:[%s5402_s25 + $0x61] sm:$0xff] }
  0x16   : > { %4672 = vmatpush3.msk.msra.mxu1 %vm335_vm0, %v203_v2  ;;  %4872 = vmatpush3.msk.msra.mxu0 %vm335_vm0, %v4087_v3  ;;  %v5459_v15 = vld [vmem:[%s5402_s25 + $0x69] sm:$0xff]  ;;  %v5462_v16 = vld [vmem:[%s5402_s25 + $0x79] sm:$0xff]  ;;  %v5473_v17 = vld [vmem:[%s5402_s25 + $0x81] sm:$0xff] }
  0x17   : > { %4626 = vmatprep.mubr.msk.f32.mxu1 %vm238_vm1, %v3989_v5  ;;  %4826 = vmatprep.mubr.msk.f32.mxu0 %vm238_vm1, %v5411_v8  ;;  %v5476_v18 = vld [vmem:[%s5402_s25 + $0x91] sm:$0xff]  ;;  %v5487_v19 = vld [vmem:[%s5402_s25 + $0x99] sm:$0xff]  ;;  %v5490_v20 = vld [vmem:[%s5402_s25 + $0xa9] sm:$0xff] }
  0x18   : > { %4921 = vmatprep.subr.msk.mxu0 %vm335_vm0, %v4153_v9  ;;  %4721 = vmatprep.subr.msk.mxu1 %vm335_vm0, %v5421_v10  ;;  %v5501_v21 = vld [vmem:[%s5402_s25 + $0xb1] sm:$0xff]  ;;  %v5504_v22 = vld [vmem:[%s5402_s25 + $0xc1] sm:$0xff]  ;;  %v5515_v23 = vld [vmem:[%s5402_s25 + $0xc9] sm:$0xff] }
  0x19   : > { %4627 = vmatmul.mubr.msk.f32.gmra.mrb[2].mxu1 %vm238_vm1, %v3990_v7  ;;  %4827 = vmatmul.mubr.msk.f32.gmra.mrb[2].mxu0 %vm238_vm1, %v5426_v11  ;;  %v5518_v24 = vld [vmem:[%s5402_s25 + $0x1a] sm:$0xff]  ;;  %v5529_v25 = vld [vmem:[%s5402_s25 + $0x22] sm:$0xff]  ;;  %v5535_v27 = vld [vmem:[%s5402_s25 + $0x32] sm:$0xff] }
  0x1a   : > { %4629 = vmatprep.mubr.msk.f32.mxu1 %vm238_vm1, %v5411_v8  ;;  %4829 = vmatprep.mubr.msk.f32.mxu0 %vm238_vm1, %v5432_v12  ;;  %v5532_v26 = vld [vmem:[%s5402_s25 + $0xd9] sm:$0xff]  ;;  %v5550_v29 = vld [vmem:[%s5402_s25 + $0xe1] sm:$0xff]  ;;  %v5558_v31 = vld [vmem:[%s5402_s25 + $0xf1] sm:$0xff] }
  0x1b   : > { %6521 = vst [vmem:[#allocation2_spill] sm:$0xff] %v5550_v29  ;;  %v5553_v30 = vld [vmem:[%s5402_s25 + $0x3a] sm:$0xff]  ;;  %6522 = vst [vmem:[#allocation3_spill] sm:$0xff] %v5558_v31  ;;  %v5561_v32 = vld [vmem:[%s5402_s25 + $0x4a] sm:$0xff] }
  0x1c   : > { %v5574_v33 = vld [vmem:[%s5402_s25 + $0xf9] sm:$0xff]  ;;  %v5580_v35 = vld [vmem:[%s5402_s25 + $0x109] sm:$0xff]  ;;  %v5594_v37 = vld [vmem:[%s5402_s25 + $0x111] sm:$0xff] }
  0x1d   : > { %4630 = vmatmul.mubr.msk.f32.gmra.mrb[4].mxu1 %vm238_vm1, %v5426_v11  ;;  %4830 = vmatmul.mubr.msk.f32.gmra.mrb[4].mxu0 %vm238_vm1, %v5445_v13  ;;  %6523 = vst [vmem:[#allocation4_spill] sm:$0xff] %v5574_v33  ;;  %v5577_v34 = vld [vmem:[%s5402_s25 + $0x52] sm:$0xff]  ;;  %6524 = vst [vmem:[#allocation5_spill] sm:$0xff] %v5580_v35  ;;  %v5583_v36 = vld [vmem:[%s5402_s25 + $0x62] sm:$0xff] }
  0x1e   : > { %4632 = vmatprep.mubr.msk.f32.mxu1 %vm238_vm1, %v5432_v12  ;;  %4832 = vmatprep.mubr.msk.f32.mxu0 %vm238_vm1, %v5448_v14  ;;  %6525 = vst [vmem:[#allocation6_spill] sm:$0xff] %v5594_v37  ;;  %v5597_v38 = vld [vmem:[%s5402_s25 + $0x6a] sm:$0xff]  ;;  %v5600_v39 = vld [vmem:[%s5402_s25 + $0x121] sm:$0xff]  ;;  %v5620_v43 = vld [vmem:[%s5402_s25 + $0x139] sm:$0xff] }
  0x1f   : > { %6526 = vst [vmem:[#allocation7_spill] sm:$0xff] %v5600_v39  ;;  %v5603_v40 = vld [vmem:[%s5402_s25 + $0x7a] sm:$0xff]  ;;  %v5614_v41 = vld [vmem:[%s5402_s25 + $0x129] sm:$0xff]  ;;  %6528 = vst [vmem:[#allocation9_spill] sm:$0xff] %v5620_v43 }
  0x20   : > { %6527 = vst [vmem:[#allocation8_spill] sm:$0xff] %v5614_v41  ;;  %v5617_v42 = vld [vmem:[%s5402_s25 + $0x82] sm:$0xff]  ;;  %v5623_v44 = vld [vmem:[%s5402_s25 + $0x92] sm:$0xff]  ;;  %v5637_v46 = vld [vmem:[%s5402_s25 + $0x9a] sm:$0xff] }
  0x21   : > { %4633 = vmatmul.mubr.msk.f32.gmra.mrb[6].mxu1 %vm238_vm1, %v5445_v13  ;;  %4833 = vmatmul.mubr.msk.f32.gmra.mrb[6].mxu0 %vm238_vm1, %v5459_v15  ;;  %v5634_v45 = vld [vmem:[%s5402_s25 + $0x141] sm:$0xff]  ;;  %v5640_v47 = vld [vmem:[%s5402_s25 + $0x151] sm:$0xff]  ;;  %v5654_v49 = vld [vmem:[%s5402_s25 + $0x159] sm:$0xff] }
  0x22   : > { %4635 = vmatprep.mubr.msk.f32.mxu1 %vm238_vm1, %v5448_v14  ;;  %4835 = vmatprep.mubr.msk.f32.mxu0 %vm238_vm1, %v5462_v16  ;;  %6529 = vst [vmem:[#allocation10_spill] sm:$0xff] %v5634_v45  ;;  %6530 = vst [vmem:[#allocation11_spill] sm:$0xff] %v5640_v47  ;;  %v5643_v48 = vld [vmem:[%s5402_s25 + $0xaa] sm:$0xff]  ;;  %v5657_v50 = vld [vmem:[%s5402_s25 + $0xb2] sm:$0xff] }
  0x23   : > { %6531 = vst [vmem:[#allocation12_spill] sm:$0xff] %v5654_v49  ;;  %v5660_v51 = vld [vmem:[%s5402_s25 + $0x169] sm:$0xff]  ;;  %v5674_v53 = vld [vmem:[%s5402_s25 + $0x171] sm:$0xff]  ;;  %v171_v55 = vld [vmem:[%s5402_s25] sm:$0xff] }
  0x24   : > { %6532 = vst [vmem:[#allocation13_spill] sm:$0xff] %v5660_v51  ;;  %v5663_v52 = vld [vmem:[%s5402_s25 + $0xc2] sm:$0xff]  ;;  %6533 = vst [vmem:[#allocation14_spill] sm:$0xff] %v5674_v53  ;;  %v5677_v54 = vld [vmem:[%s5402_s25 + $0xca] sm:$0xff] }
  0x25   : > { %4636 = vmatmul.mubr.msk.f32.gmra.mrb[8].mxu1 %vm238_vm1, %v5459_v15  ;;  %4836 = vmatmul.mubr.msk.f32.gmra.mrb[8].mxu0 %vm238_vm1, %v5473_v17  ;;  %v5681_v56 = vld [vmem:[%s5402_s25 + $0xda] sm:$0xff]  ;;  %v172_v57 = vld [vmem:[%s5402_s25 + $0x8] sm:$0xff]  ;;  %v5698_v60 = vld [vmem:[%s5402_s25 + $0xf2] sm:$0xff] }
  0x26   : > { %4638 = vmatprep.mubr.msk.f32.mxu1 %vm238_vm1, %v5462_v16  ;;  %4838 = vmatprep.mubr.msk.f32.mxu0 %vm238_vm1, %v5476_v18  ;;  %v5692_v58 = vld [vmem:[%s5402_s25 + $0xe2] sm:$0xff]  ;;  %v5695_v59 = vld [vmem:[%s5402_s25 + $0x18] sm:$0xff]  ;;  %v5721_v0 = vld [vmem:[%s5402_s25 + $0x30] sm:$0xff] }
  0x27   : > { %6534 = vst [vmem:[#allocation15_spill] sm:$0xff] %v5695_v59  ;;  %v5713_v62 = vld [vmem:[%s5402_s25 + $0x20] sm:$0xff]  ;;  %6536 = vst [vmem:[#allocation17_spill] sm:$0xff] %v5721_v0  ;;  %v5724_v2 = vld [vmem:[%s5402_s25 + $0x10a] sm:$0xff] }
  0x28   : > { %6535 = vst [vmem:[#allocation16_spill] sm:$0xff] %v5713_v62  ;;  %v5716_v63 = vld [vmem:[%s5402_s25 + $0xfa] sm:$0xff]  ;;  %v5740_v4 = vld [vmem:[%s5402_s25 + $0x112] sm:$0xff]  ;;  %v5743_v5 = vld [vmem:[%s5402_s25 + $0x48] sm:$0xff] }
  0x29   : > { %4639 = vmatmul.mubr.msk.f32.gmra.mrb[10].mxu1 %vm238_vm1, %v5473_v17  ;;  %4839 = vmatmul.mubr.msk.f32.gmra.mrb[10].mxu0 %vm238_vm1, %v5487_v19  ;;  %v5737_v3 = vld [vmem:[%s5402_s25 + $0x38] sm:$0xff]  ;;  %6538 = vst [vmem:[#allocation19_spill] sm:$0xff] %v5743_v5  ;;  %v5746_v6 = vld [vmem:[%s5402_s25 + $0x122] sm:$0xff]  ;;  %v5757_v7 = vld [vmem:[%s5402_s25 + $0x50] sm:$0xff] }
  0x2a   : > { %4641 = vmatprep.mubr.msk.f32.mxu1 %vm238_vm1, %v5476_v18  ;;  %4841 = vmatprep.mubr.msk.f32.mxu0 %vm238_vm1, %v5490_v20  ;;  %6537 = vst [vmem:[#allocation18_spill] sm:$0xff] %v5737_v3  ;;  %6539 = vst [vmem:[#allocation20_spill] sm:$0xff] %v5757_v7 }
  0x2d   : > { %4642 = vmatmul.mubr.msk.f32.gmra.mrb[12].mxu1 %vm238_vm1, %v5487_v19  ;;  %4842 = vmatmul.mubr.msk.f32.gmra.mrb[12].mxu0 %vm238_vm1, %v5501_v21 }
  0x2e   : > { %4644 = vmatprep.mubr.msk.f32.mxu1 %vm238_vm1, %v5490_v20  ;;  %4844 = vmatprep.mubr.msk.f32.mxu0 %vm238_vm1, %v5504_v22 }
  0x31   : > { %4645 = vmatmul.mubr.msk.f32.gmra.mrb[14].mxu1 %vm238_vm1, %v5501_v21  ;;  %4845 = vmatmul.mubr.msk.f32.gmra.mrb[14].mxu0 %vm238_vm1, %v5515_v23 }
  0x32   : > { %4647 = vmatprep.mubr.msk.f32.mxu1 %vm238_vm1, %v5504_v22  ;;  %4873 = vmatprep.mubr.msk.f32.mxu0 %vm238_vm1, %v5518_v24 }
  0x35   : > { %4648 = vmatmul.mubr.msk.f32.gmra.mrb[16].mxu1 %vm238_vm1, %v5515_v23  ;;  %4874 = vmatmul.mubr.msk.f32.vlgmr.msra.gmra.mrb[0].mxu0 %vm238_vm1, %v5529_v25 }
  0x36   : > { %4922 = vmatpush3.msk.msra.mxu0 %vm335_vm0, %v4153_v9  ;;  %4650 = vmatprep.mubr.msk.f32.mxu1 %vm238_vm1, %v5532_v26  ;;  %v5760_v9 = vld [vmem:[%s5402_s25 + $0x12a] sm:$0xff] }
  0x37   : > { %4876 = vmatprep.mubr.msk.f32.mxu0 %vm238_vm1, %v5535_v27  ;;  %4971 = vmatprep.subr.msk.mxu0 %vm335_vm0, %v5540_v28 }
  0x39   : > { %4651 = vmatmul.mubr.msk.f32.gmra.mrb[18].mxu1 %vm238_vm1, %v5550_v29  ;;  %4877 = vmatmul.mubr.msk.f32.gmra.mrb[2].mxu0 %vm238_vm1, %v5553_v30  ;;  %v5857_v29 = vld [vmem:[%s5402_s25 + $0xd8] sm:$0xff] }
  0x3a   : > { %4653 = vmatprep.mubr.msk.f32.mxu1 %vm238_vm1, %v5558_v31  ;;  %4879 = vmatprep.mubr.msk.f32.mxu0 %vm238_vm1, %v5561_v32  ;;  %v5840_v31 = vld [vmem:[%s5402_s25 + $0x18a] sm:$0xff] }
  0x3b   : > { %6550 = vst [vmem:[#allocation31_spill] sm:$0xff] %v5840_v31 }
  0x3d   : > { %4654 = vmatmul.mubr.msk.f32.gmra.mrb[20].mxu1 %vm238_vm1, %v5574_v33  ;;  %4880 = vmatmul.mubr.msk.f32.gmra.mrb[4].mxu0 %vm238_vm1, %v5577_v34  ;;  %v5826_v33 = vld [vmem:[%s5402_s25 + $0x182] sm:$0xff] }
  0x3e   : > { %4656 = vmatprep.mubr.msk.f32.mxu1 %vm238_vm1, %v5580_v35  ;;  %4882 = vmatprep.mubr.msk.f32.mxu0 %vm238_vm1, %v5583_v36  ;;  %v5823_v35 = vld [vmem:[%s5402_s25 + $0xa8] sm:$0xff]  ;;  %6548 = vst [vmem:[#allocation29_spill] sm:$0xff] %v5826_v33 }
  0x3f   : > { %6547 = vst [vmem:[#allocation28_spill] sm:$0xff] %v5823_v35 }
  0x41   : > { %4657 = vmatmul.mubr.msk.f32.gmra.mrb[22].mxu1 %vm238_vm1, %v5594_v37  ;;  %4883 = vmatmul.mubr.msk.f32.gmra.mrb[6].mxu0 %vm238_vm1, %v5597_v38  ;;  %v5820_v37 = vld [vmem:[%s5402_s25 + $0x172] sm:$0xff] }
  0x42   : > { %4659 = vmatprep.mubr.msk.f32.mxu1 %vm238_vm1, %v5600_v39  ;;  %4885 = vmatprep.mubr.msk.f32.mxu0 %vm238_vm1, %v5603_v40  ;;  %v5817_v39 = vld [vmem:[%s5402_s25 + $0x98] sm:$0xff]  ;;  %6546 = vst [vmem:[#allocation27_spill] sm:$0xff] %v5820_v37 }
  0x43   : > { %6545 = vst [vmem:[#allocation26_spill] sm:$0xff] %v5817_v39 }
  0x45   : > { %4660 = vmatmul.mubr.msk.f32.gmra.mrb[24].mxu1 %vm238_vm1, %v5614_v41  ;;  %4886 = vmatmul.mubr.msk.f32.gmra.mrb[8].mxu0 %vm238_vm1, %v5617_v42  ;;  %v5806_v41 = vld [vmem:[%s5402_s25 + $0x16a] sm:$0xff] }
  0x46   : > { %4662 = vmatprep.mubr.msk.f32.mxu1 %vm238_vm1, %v5620_v43  ;;  %4888 = vmatprep.mubr.msk.f32.mxu0 %vm238_vm1, %v5623_v44  ;;  %v5803_v43 = vld [vmem:[%s5402_s25 + $0x90] sm:$0xff] }
  0x47   : > { %6544 = vst [vmem:[#allocation25_spill] sm:$0xff] %v5803_v43 }
  0x49   : > { %4663 = vmatmul.mubr.msk.f32.gmra.mrb[26].mxu1 %vm238_vm1, %v5634_v45  ;;  %4889 = vmatmul.mubr.msk.f32.gmra.mrb[10].mxu0 %vm238_vm1, %v5637_v46  ;;  %v5800_v45 = vld [vmem:[%s5402_s25 + $0x15a] sm:$0xff] }
  0x4a   : > { %4665 = vmatprep.mubr.msk.f32.mxu1 %vm238_vm1, %v5640_v47  ;;  %4891 = vmatprep.mubr.msk.f32.mxu0 %vm238_vm1, %v5643_v48  ;;  %v5797_v47 = vld [vmem:[%s5402_s25 + $0x80] sm:$0xff] }
  0x4b   : > { %6543 = vst [vmem:[#allocation24_spill] sm:$0xff] %v5797_v47 }
  0x4d   : > { %4666 = vmatmul.mubr.msk.f32.gmra.mrb[28].mxu1 %vm238_vm1, %v5654_v49  ;;  %4892 = vmatmul.mubr.msk.f32.gmra.mrb[12].mxu0 %vm238_vm1, %v5657_v50  ;;  %v5786_v49 = vld [vmem:[%s5402_s25 + $0x152] sm:$0xff] }
  0x4e   : > { %4668 = vmatprep.mubr.msk.f32.mxu1 %vm238_vm1, %v5660_v51  ;;  %4894 = vmatprep.mubr.msk.f32.mxu0 %vm238_vm1, %v5663_v52  ;;  %v5783_v51 = vld [vmem:[%s5402_s25 + $0x78] sm:$0xff] }
  0x4f   : > { %6542 = vst [vmem:[#allocation23_spill] sm:$0xff] %v5783_v51 }
  0x51   : > { %4669 = vmatmul.mubr.msk.f32.gmra.mrb[30].mxu1 %vm238_vm1, %v5674_v53  ;;  %4895 = vmatmul.mubr.msk.f32.gmra.mrb[14].mxu0 %vm238_vm1, %v5677_v54  ;;  %v5780_v53 = vld [vmem:[%s5402_s25 + $0x142] sm:$0xff] }
  0x52   : > { %4673 = vmatprep.mubr.msk.f32.mxu1 %vm238_vm1, %v171_v55  ;;  %4897 = vmatprep.mubr.msk.f32.mxu0 %vm238_vm1, %v5681_v56  ;;  %v5766_v55 = vld [vmem:[%s5402_s25 + $0x13a] sm:$0xff] }
  0x55   : > { %4674 = vmatmul.mubr.msk.f32.vlgmr.msra.gmra.mrb[0].mxu1 %vm238_vm1, %v172_v57  ;;  %4898 = vmatmul.mubr.msk.f32.gmra.mrb[16].mxu0 %vm238_vm1, %v5692_v58  ;;  %v5777_v57 = vld [vmem:[%s5402_s25 + $0x68] sm:$0xff] }
  0x56   : > { %4722 = vmatpush3.msk.msra.mxu1 %vm335_vm0, %v5421_v10  ;;  %4676 = vmatprep.mubr.msk.f32.mxu1 %vm238_vm1, %v5695_v59  ;;  %v5763_v10 = vld [vmem:[%s5402_s25 + $0x60] sm:$0xff]  ;;  %6541 = vst [vmem:[#allocation22_spill] sm:$0xff] %v5777_v57 }
  0x57   : > { %4900 = vmatprep.mubr.msk.f32.mxu0 %vm238_vm1, %v5698_v60  ;;  %4771 = vmatprep.subr.msk.mxu1 %vm335_vm0, %v5703_v61  ;;  %6540 = vst [vmem:[#allocation21_spill] sm:$0xff] %v5763_v10  ;;  %v5843_v59 = vld [vmem:[%s5402_s25 + $0xc0] sm:$0xff] }
  0x59   : > { %4677 = vmatmul.mubr.msk.f32.gmra.mrb[2].mxu1 %vm238_vm1, %v5713_v62  ;;  %4901 = vmatmul.mubr.msk.f32.gmra.mrb[18].mxu0 %vm238_vm1, %v5716_v63  ;;  %v5837_v62 = vld [vmem:[%s5402_s25 + $0xb0] sm:$0xff] }
  0x5a   : > { %4679 = vmatprep.mubr.msk.f32.mxu1 %vm238_vm1, %v5721_v0  ;;  %4903 = vmatprep.mubr.msk.f32.mxu0 %vm238_vm1, %v5724_v2  ;;  %6549 = vst [vmem:[#allocation30_spill] sm:$0xff] %v5837_v62 }
  0x5d   : > { %4680 = vmatmul.mubr.msk.f32.gmra.mrb[4].mxu1 %vm238_vm1, %v5737_v3  ;;  %4904 = vmatmul.mubr.msk.f32.gmra.mrb[20].mxu0 %vm238_vm1, %v5740_v4 }
  0x5e   : > { %4682 = vmatprep.mubr.msk.f32.mxu1 %vm238_vm1, %v5743_v5  ;;  %4906 = vmatprep.mubr.msk.f32.mxu0 %vm238_vm1, %v5746_v6 }
  0x61   : > { %4683 = vmatmul.mubr.msk.f32.gmra.mrb[6].mxu1 %vm238_vm1, %v5757_v7  ;;  %4907 = vmatmul.mubr.msk.f32.gmra.mrb[22].mxu0 %vm238_vm1, %v5760_v9 }
  0x62   : > { %4685 = vmatprep.mubr.msk.f32.mxu1 %vm238_vm1, %v5763_v10  ;;  %4909 = vmatprep.mubr.msk.f32.mxu0 %vm238_vm1, %v5766_v55 }
  0x65   : > { %4686 = vmatmul.mubr.msk.f32.gmra.mrb[8].mxu1 %vm238_vm1, %v5777_v57  ;;  %4910 = vmatmul.mubr.msk.f32.gmra.mrb[24].mxu0 %vm238_vm1, %v5780_v53 }
  0x66   : > { %4688 = vmatprep.mubr.msk.f32.mxu1 %vm238_vm1, %v5783_v51  ;;  %4912 = vmatprep.mubr.msk.f32.mxu0 %vm238_vm1, %v5786_v49 }
  0x69   : > { %4689 = vmatmul.mubr.msk.f32.gmra.mrb[10].mxu1 %vm238_vm1, %v5797_v47  ;;  %4913 = vmatmul.mubr.msk.f32.gmra.mrb[26].mxu0 %vm238_vm1, %v5800_v45 }
  0x6a   : > { %4691 = vmatprep.mubr.msk.f32.mxu1 %vm238_vm1, %v5803_v43  ;;  %4915 = vmatprep.mubr.msk.f32.mxu0 %vm238_vm1, %v5806_v41 }
  0x6d   : > { %4692 = vmatmul.mubr.msk.f32.gmra.mrb[12].mxu1 %vm238_vm1, %v5817_v39  ;;  %4916 = vmatmul.mubr.msk.f32.gmra.mrb[28].mxu0 %vm238_vm1, %v5820_v37  ;;  %v5862_v37 = vld [vmem:[%s6473_s1 + $0x20] sm:$0xf] }
  0x6e   : > { %4694 = vmatprep.mubr.msk.f32.mxu1 %vm238_vm1, %v5823_v35  ;;  %4918 = vmatprep.mubr.msk.f32.mxu0 %vm238_vm1, %v5826_v33  ;;  %v5854_v33 = vld [vmem:[%s5402_s25 + $0xc8] sm:$0xff] }
  0x6f   : > { %6551 = vst [vmem:[#allocation32_spill] sm:$0xff] %v5854_v33 }
  0x71   : > { %4695 = vmatmul.mubr.msk.f32.gmra.mrb[14].mxu1 %vm238_vm1, %v5837_v62  ;;  %4919 = vmatmul.mubr.msk.f32.gmra.mrb[30].mxu0 %vm238_vm1, %v5840_v31  ;;  %v5873_v31 = vld [vmem:[%s5402_s25 + $0xe0] sm:$0xff] }
  0x72   : > { %4697 = vmatprep.mubr.msk.f32.mxu1 %vm238_vm1, %v5843_v59  ;;  %4923 = vmatprep.mubr.msk.f32.mxu0 %vm238_vm1, %v5721_v0  ;;  %v5878_v0 = vld [vmem:[%s5402_s25 + $0xf0] sm:$0xff] }
  0x75   : > { %4698 = vmatmul.mubr.msk.f32.gmra.mrb[16].mxu1 %vm238_vm1, %v5854_v33  ;;  %4924 = vmatmul.mubr.msk.f32.vlgmr.msra.gmra.mrb[0].mxu0 %vm238_vm1, %v5737_v3  ;;  %v888_v3 = vld [vmem:[%s5402_s25 + $0x2] sm:$0xff] }
  0x76   : > { %4972 = vmatpush3.msk.msra.mxu0 %vm335_vm0, %v5540_v28  ;;  %4700 = vmatprep.mubr.msk.f32.mxu1 %vm238_vm1, %v5857_v29  ;;  %v5891_v28 = vld [vmem:[%s5402_s25 + $0xf8] sm:$0xff] }
  0x77   : > { %4926 = vmatprep.mubr.msk.f32.mxu0 %vm238_vm1, %v5743_v5  ;;  %5021 = vmatprep.subr.msk.mxu0 %vm335_vm0, %v5862_v37  ;;  %v5894_v5 = vld [vmem:[%s5402_s25 + $0x108] sm:$0xff] }
  0x79   : > { %4701 = vmatmul.mubr.msk.f32.gmra.mrb[18].mxu1 %vm238_vm1, %v5873_v31  ;;  %4927 = vmatmul.mubr.msk.f32.gmra.mrb[2].mxu0 %vm238_vm1, %v5757_v7  ;;  %v5905_v7 = vld [vmem:[%s5402_s25 + $0x110] sm:$0xff] }
  0x7a   : > { %4703 = vmatprep.mubr.msk.f32.mxu1 %vm238_vm1, %v5878_v0  ;;  %4929 = vmatprep.mubr.msk.f32.mxu0 %vm238_vm1, %v5763_v10  ;;  %v5908_v10 = vld [vmem:[%s5402_s25 + $0x120] sm:$0xff] }
  0x7d   : > { %4704 = vmatmul.mubr.msk.f32.gmra.mrb[20].mxu1 %vm238_vm1, %v5891_v28  ;;  %4930 = vmatmul.mubr.msk.f32.gmra.mrb[4].mxu0 %vm238_vm1, %v5777_v57  ;;  %v5919_v57 = vld [vmem:[%s5402_s25 + $0x128] sm:$0xff] }
  0x7e   : > { %4706 = vmatprep.mubr.msk.f32.mxu1 %vm238_vm1, %v5894_v5  ;;  %4932 = vmatprep.mubr.msk.f32.mxu0 %vm238_vm1, %v5783_v51  ;;  %v5922_v51 = vld [vmem:[%s5402_s25 + $0x138] sm:$0xff] }
  0x81   : > { %4707 = vmatmul.mubr.msk.f32.gmra.mrb[22].mxu1 %vm238_vm1, %v5905_v7  ;;  %4933 = vmatmul.mubr.msk.f32.gmra.mrb[6].mxu0 %vm238_vm1, %v5797_v47  ;;  %v5933_v47 = vld [vmem:[%s5402_s25 + $0x140] sm:$0xff] }
  0x82   : > { %4709 = vmatprep.mubr.msk.f32.mxu1 %vm238_vm1, %v5908_v10  ;;  %4935 = vmatprep.mubr.msk.f32.mxu0 %vm238_vm1, %v5803_v43  ;;  %v5936_v43 = vld [vmem:[%s5402_s25 + $0x150] sm:$0xff] }
  0x85   : > { %4710 = vmatmul.mubr.msk.f32.gmra.mrb[24].mxu1 %vm238_vm1, %v5919_v57  ;;  %4936 = vmatmul.mubr.msk.f32.gmra.mrb[8].mxu0 %vm238_vm1, %v5817_v39  ;;  %v5947_v39 = vld [vmem:[%s5402_s25 + $0x158] sm:$0xff] }
  0x86   : > { %4712 = vmatprep.mubr.msk.f32.mxu1 %vm238_vm1, %v5922_v51  ;;  %4938 = vmatprep.mubr.msk.f32.mxu0 %vm238_vm1, %v5823_v35  ;;  %v5950_v35 = vld [vmem:[%s5402_s25 + $0x168] sm:$0xff] }
  0x89   : > { %4713 = vmatmul.mubr.msk.f32.gmra.mrb[26].mxu1 %vm238_vm1, %v5933_v47  ;;  %4939 = vmatmul.mubr.msk.f32.gmra.mrb[10].mxu0 %vm238_vm1, %v5837_v62  ;;  %v5961_v62 = vld [vmem:[%s5402_s25 + $0x170] sm:$0xff] }
  0x8a   : > { %4715 = vmatprep.mubr.msk.f32.mxu1 %vm238_vm1, %v5936_v43  ;;  %4941 = vmatprep.mubr.msk.f32.mxu0 %vm238_vm1, %v5843_v59 }
  0x8d   : > { %4716 = vmatmul.mubr.msk.f32.gmra.mrb[28].mxu1 %vm238_vm1, %v5947_v39  ;;  %4942 = vmatmul.mubr.msk.f32.gmra.mrb[12].mxu0 %vm238_vm1, %v5854_v33  ;;  %v889_v33 = vld [vmem:[%s5402_s25 + $0xa] sm:$0xff] }
  0x8e   : > { %4718 = vmatprep.mubr.msk.f32.mxu1 %vm238_vm1, %v5950_v35  ;;  %4944 = vmatprep.mubr.msk.f32.mxu0 %vm238_vm1, %v5857_v29 }
  0x91   : > { %4719 = vmatmul.mubr.msk.f32.gmra.mrb[30].mxu1 %vm238_vm1, %v5961_v62  ;;  %4945 = vmatmul.mubr.msk.f32.gmra.mrb[14].mxu0 %vm238_vm1, %v5873_v31 }
  0x92   : > { %4723 = vmatprep.mubr.msk.f32.mxu1 %vm238_vm1, %v888_v3  ;;  %4947 = vmatprep.mubr.msk.f32.mxu0 %vm238_vm1, %v5878_v0  ;;  %v6568_v3 = vld [vmem:[#allocation22_spill] sm:$0xff] }
  0x95   : > { %4724 = vmatmul.mubr.msk.f32.vlgmr.msra.gmra.mrb[0].mxu1 %vm238_vm1, %v889_v33  ;;  %4948 = vmatmul.mubr.msk.f32.gmra.mrb[16].mxu0 %vm238_vm1, %v5891_v28  ;;  %v4151_v33 = vld [vmem:[%s5402_s25 + $0x198] sm:$0xff] }
  0x96   : > { %4772 = vmatpush3.msk.msra.mxu1 %vm335_vm0, %v5703_v61  ;;  %4726 = vmatprep.mubr.msk.f32.mxu1 %vm238_vm1, %v5518_v24  ;;  %v6016_v24 = vld [vmem:[%s5402_s25 + $0x180] sm:$0xff] }
  0x97   : > { %4950 = vmatprep.mubr.msk.f32.mxu0 %vm238_vm1, %v5894_v5  ;;  %5071 = vmatprep.subr.msk.mxu1 %vm335_vm0, %v5380_v1  ;;  %v4152_v61 = vld [vmem:[%s5402_s25 + $0x1a0] sm:$0xff] }
  0x99   : > { %4727 = vmatmul.mubr.msk.f32.gmra.mrb[2].mxu1 %vm238_vm1, %v5529_v25  ;;  %4951 = vmatmul.mubr.msk.f32.gmra.mrb[18].mxu0 %vm238_vm1, %v5905_v7  ;;  %v6027_v25 = vld [vmem:[%s5402_s25 + $0x188] sm:$0xff] }
  0x9a   : > { %4729 = vmatprep.mubr.msk.f32.mxu1 %vm238_vm1, %v5535_v27  ;;  %4953 = vmatprep.mubr.msk.f32.mxu0 %vm238_vm1, %v5908_v10 }
  0x9d   : > { %4730 = vmatmul.mubr.msk.f32.gmra.mrb[4].mxu1 %vm238_vm1, %v5553_v30  ;;  %4954 = vmatmul.mubr.msk.f32.gmra.mrb[20].mxu0 %vm238_vm1, %v5919_v57 }
  0x9e   : > { %4732 = vmatprep.mubr.msk.f32.mxu1 %vm238_vm1, %v5561_v32  ;;  %4956 = vmatprep.mubr.msk.f32.mxu0 %vm238_vm1, %v5922_v51 }
  0xa1   : > { %4733 = vmatmul.mubr.msk.f32.gmra.mrb[6].mxu1 %vm238_vm1, %v5577_v34  ;;  %4957 = vmatmul.mubr.msk.f32.gmra.mrb[22].mxu0 %vm238_vm1, %v5933_v47 }
  0xa2   : > { %4735 = vmatprep.mubr.msk.f32.mxu1 %vm238_vm1, %v5583_v36  ;;  %4959 = vmatprep.mubr.msk.f32.mxu0 %vm238_vm1, %v5936_v43 }
  0xa5   : > { %4736 = vmatmul.mubr.msk.f32.gmra.mrb[8].mxu1 %vm238_vm1, %v5597_v38  ;;  %4960 = vmatmul.mubr.msk.f32.gmra.mrb[24].mxu0 %vm238_vm1, %v5947_v39 }
  0xa6   : > { %4738 = vmatprep.mubr.msk.f32.mxu1 %vm238_vm1, %v5603_v40  ;;  %4962 = vmatprep.mubr.msk.f32.mxu0 %vm238_vm1, %v5950_v35 }
  0xa9   : > { %4739 = vmatmul.mubr.msk.f32.gmra.mrb[10].mxu1 %vm238_vm1, %v5617_v42  ;;  %4963 = vmatmul.mubr.msk.f32.gmra.mrb[26].mxu0 %vm238_vm1, %v5961_v62 }
  0xaa   : > { %4741 = vmatprep.mubr.msk.f32.mxu1 %vm238_vm1, %v5623_v44  ;;  %4965 = vmatprep.mubr.msk.f32.mxu0 %vm238_vm1, %v6016_v24 }
  0xad   : > { %4742 = vmatmul.mubr.msk.f32.gmra.mrb[12].mxu1 %vm238_vm1, %v5637_v46  ;;  %4966 = vmatmul.mubr.msk.f32.gmra.mrb[28].mxu0 %vm238_vm1, %v6027_v25 }
  0xae   : > { %4744 = vmatprep.mubr.msk.f32.mxu1 %vm238_vm1, %v5643_v48  ;;  %4968 = vmatprep.mubr.msk.f32.mxu0 %vm238_vm1, %v4151_v33  ;;  %v6569_v33 = vld [vmem:[#allocation10_spill] sm:$0xff] }
  0xb1   : > { %4745 = vmatmul.mubr.msk.f32.gmra.mrb[14].mxu1 %vm238_vm1, %v5657_v50  ;;  %4969 = vmatmul.mubr.msk.f32.gmra.mrb[30].mxu0 %vm238_vm1, %v4152_v61  ;;  %v6570_v61 = vld [vmem:[#allocation23_spill] sm:$0xff] }
  0xb2   : > { %4747 = vmatprep.mubr.msk.f32.mxu1 %vm238_vm1, %v5663_v52  ;;  %4973 = vmatprep.mubr.msk.f32.mxu0 %vm238_vm1, %v5411_v8  ;;  %v6552_v8 = vld [vmem:[#allocation27_spill] sm:$0xff] }
  0xb5   : > { %4748 = vmatmul.mubr.msk.f32.gmra.mrb[16].mxu1 %vm238_vm1, %v5677_v54  ;;  %4974 = vmatmul.mubr.msk.f32.vlgmr.msra.gmra.mrb[0].mxu0 %vm238_vm1, %v5426_v11  ;;  %v6553_v11 = vld [vmem:[#allocation2_spill] sm:$0xff] }
  0xb6   : > { %5022 = vmatpush3.msk.msra.mxu0 %vm335_vm0, %v5862_v37  ;;  %4750 = vmatprep.mubr.msk.f32.mxu1 %vm238_vm1, %v5681_v56  ;;  %v6567_v37 = vld [vmem:[#allocation9_spill] sm:$0xff] }
  0xb7   : > { %4976 = vmatprep.mubr.msk.f32.mxu0 %vm238_vm1, %v5432_v12  ;;  %v6554_v12 = vld [vmem:[#allocation15_spill] sm:$0xff] }
  0xb9   : > { %4751 = vmatmul.mubr.msk.f32.gmra.mrb[18].mxu1 %vm238_vm1, %v5692_v58  ;;  %4977 = vmatmul.mubr.msk.f32.gmra.mrb[2].mxu0 %vm238_vm1, %v5445_v13  ;;  %v6555_v13 = vld [vmem:[#allocation3_spill] sm:$0xff] }
  0xba   : > { %4753 = vmatprep.mubr.msk.f32.mxu1 %vm238_vm1, %v5698_v60  ;;  %4979 = vmatprep.mubr.msk.f32.mxu0 %vm238_vm1, %v5448_v14  ;;  %v6556_v14 = vld [vmem:[#allocation16_spill] sm:$0xff] }
  0xbd   : > { %4754 = vmatmul.mubr.msk.f32.gmra.mrb[20].mxu1 %vm238_vm1, %v5716_v63  ;;  %4980 = vmatmul.mubr.msk.f32.gmra.mrb[4].mxu0 %vm238_vm1, %v5459_v15  ;;  %v6557_v15 = vld [vmem:[#allocation4_spill] sm:$0xff] }
  0xbe   : > { %4756 = vmatprep.mubr.msk.f32.mxu1 %vm238_vm1, %v5724_v2  ;;  %4982 = vmatprep.mubr.msk.f32.mxu0 %vm238_vm1, %v5462_v16  ;;  %v6558_v16 = vld [vmem:[#allocation17_spill] sm:$0xff] }
  0xc1   : > { %4757 = vmatmul.mubr.msk.f32.gmra.mrb[22].mxu1 %vm238_vm1, %v5740_v4  ;;  %4983 = vmatmul.mubr.msk.f32.gmra.mrb[6].mxu0 %vm238_vm1, %v5473_v17  ;;  %v6559_v17 = vld [vmem:[#allocation5_spill] sm:$0xff] }
  0xc2   : > { %4759 = vmatprep.mubr.msk.f32.mxu1 %vm238_vm1, %v5746_v6  ;;  %4985 = vmatprep.mubr.msk.f32.mxu0 %vm238_vm1, %v5476_v18  ;;  %v6560_v18 = vld [vmem:[#allocation18_spill] sm:$0xff] }
  0xc5   : > { %4760 = vmatmul.mubr.msk.f32.gmra.mrb[24].mxu1 %vm238_vm1, %v5760_v9  ;;  %4986 = vmatmul.mubr.msk.f32.gmra.mrb[8].mxu0 %vm238_vm1, %v5487_v19  ;;  %v6561_v19 = vld [vmem:[#allocation6_spill] sm:$0xff] }
  0xc6   : > { %4762 = vmatprep.mubr.msk.f32.mxu1 %vm238_vm1, %v5766_v55  ;;  %4988 = vmatprep.mubr.msk.f32.mxu0 %vm238_vm1, %v5490_v20  ;;  %v6562_v20 = vld [vmem:[#allocation19_spill] sm:$0xff] }
  0xc9   : > { %4763 = vmatmul.mubr.msk.f32.gmra.mrb[26].mxu1 %vm238_vm1, %v5780_v53  ;;  %4989 = vmatmul.mubr.msk.f32.gmra.mrb[10].mxu0 %vm238_vm1, %v5501_v21  ;;  %v6563_v21 = vld [vmem:[#allocation7_spill] sm:$0xff] }
  0xca   : > { %4765 = vmatprep.mubr.msk.f32.mxu1 %vm238_vm1, %v5786_v49  ;;  %4991 = vmatprep.mubr.msk.f32.mxu0 %vm238_vm1, %v5504_v22  ;;  %v6565_v22 = vld [vmem:[#allocation8_spill] sm:$0xff] }
  0xcd   : > { %4766 = vmatmul.mubr.msk.f32.gmra.mrb[28].mxu1 %vm238_vm1, %v5800_v45  ;;  %4992 = vmatmul.mubr.msk.f32.gmra.mrb[12].mxu0 %vm238_vm1, %v5515_v23  ;;  %v6566_v23 = vld [vmem:[#allocation21_spill] sm:$0xff] }
  0xce   : > { %4768 = vmatprep.mubr.msk.f32.mxu1 %vm238_vm1, %v5806_v41  ;;  %4994 = vmatprep.mubr.msk.f32.mxu0 %vm238_vm1, %v5532_v26 }
  0xd1   : > { %4769 = vmatmul.mubr.msk.f32.gmra.mrb[30].mxu1 %vm238_vm1, %v6552_v8  ;;  %4995 = vmatmul.mubr.msk.f32.gmra.mrb[14].mxu0 %vm238_vm1, %v6553_v11  ;;  %v6579_v8 = vld [vmem:[#allocation30_spill] sm:$0xff] }
  0xd2   : > { %4773 = vmatprep.mubr.msk.f32.mxu1 %vm238_vm1, %v6554_v12  ;;  %4997 = vmatprep.mubr.msk.f32.mxu0 %vm238_vm1, %v6555_v13  ;;  %v6571_v12 = vld [vmem:[#allocation11_spill] sm:$0xff] }
  0xd5   : > { %4774 = vmatmul.mubr.msk.f32.vlgmr.msra.gmra.mrb[0].mxu1 %vm238_vm1, %v6556_v14  ;;  %4998 = vmatmul.mubr.msk.f32.gmra.mrb[16].mxu0 %vm238_vm1, %v6557_v15  ;;  %v6572_v14 = vld [vmem:[#allocation24_spill] sm:$0xff] }
  0xd6   : > { %5072 = vmatpush3.msk.msra.mxu1 %vm335_vm0, %v5380_v1  ;;  %4776 = vmatprep.mubr.msk.f32.mxu1 %vm238_vm1, %v6558_v16  ;;  %v6564_v1 = vld [vmem:[#allocation20_spill] sm:$0xff] }
  0xd7   : > { %5000 = vmatprep.mubr.msk.f32.mxu0 %vm238_vm1, %v6559_v17  ;;  %v6573_v16 = vld [vmem:[#allocation12_spill] sm:$0xff] }
  0xd9   : > { %4777 = vmatmul.mubr.msk.f32.gmra.mrb[2].mxu1 %vm238_vm1, %v6560_v18  ;;  %5001 = vmatmul.mubr.msk.f32.gmra.mrb[18].mxu0 %vm238_vm1, %v6561_v19  ;;  %v6574_v18 = vld [vmem:[#allocation25_spill] sm:$0xff] }
  0xda   : > { %4779 = vmatprep.mubr.msk.f32.mxu1 %vm238_vm1, %v6562_v20  ;;  %5003 = vmatprep.mubr.msk.f32.mxu0 %vm238_vm1, %v6563_v21  ;;  %v6575_v20 = vld [vmem:[#allocation13_spill] sm:$0xff] }
  0xdd   : > { %4780 = vmatmul.mubr.msk.f32.gmra.mrb[4].mxu1 %vm238_vm1, %v6564_v1  ;;  %5004 = vmatmul.mubr.msk.f32.gmra.mrb[20].mxu0 %vm238_vm1, %v6565_v22  ;;  %v6154_v1 = vld [vmem:[%s5402_s25 + $0x181] sm:$0xff] }
  0xde   : > { %4782 = vmatprep.mubr.msk.f32.mxu1 %vm238_vm1, %v6566_v23  ;;  %5006 = vmatprep.mubr.msk.f32.mxu0 %vm238_vm1, %v6567_v37  ;;  %v6576_v23 = vld [vmem:[#allocation26_spill] sm:$0xff] }
  0xe1   : > { %4783 = vmatmul.mubr.msk.f32.gmra.mrb[6].mxu1 %vm238_vm1, %v6568_v3  ;;  %5007 = vmatmul.mubr.msk.f32.gmra.mrb[22].mxu0 %vm238_vm1, %v6569_v33  ;;  %v6577_v3 = vld [vmem:[#allocation14_spill] sm:$0xff] }
  0xe2   : > { %4785 = vmatprep.mubr.msk.f32.mxu1 %vm238_vm1, %v6570_v61  ;;  %5009 = vmatprep.mubr.msk.f32.mxu0 %vm238_vm1, %v6571_v12  ;;  %v6578_v61 = vld [vmem:[#allocation28_spill] sm:$0xff] }
  0xe5   : > { %4786 = vmatmul.mubr.msk.f32.gmra.mrb[8].mxu1 %vm238_vm1, %v6572_v14  ;;  %5010 = vmatmul.mubr.msk.f32.gmra.mrb[24].mxu0 %vm238_vm1, %v6573_v16  ;;  %v6165_v14 = vld [vmem:[%s5402_s25 + $0x189] sm:$0xff] }
  0xe6   : > { %4788 = vmatprep.mubr.msk.f32.mxu1 %vm238_vm1, %v6574_v18  ;;  %5012 = vmatprep.mubr.msk.f32.mxu0 %vm238_vm1, %v6575_v20  ;;  %v4217_v18 = vld [vmem:[%s5402_s25 + $0x199] sm:$0xff] }
  0xe9   : > { %4789 = vmatmul.mubr.msk.f32.gmra.mrb[10].mxu1 %vm238_vm1, %v6576_v23  ;;  %5013 = vmatmul.mubr.msk.f32.gmra.mrb[26].mxu0 %vm238_vm1, %v6577_v3  ;;  %v4218_v23 = vld [vmem:[%s5402_s25 + $0x1a1] sm:$0xff]  ;;  %v6580_v3 = vld [vmem:[#allocation32_spill] sm:$0xff] }
  0xea   : > { %4791 = vmatprep.mubr.msk.f32.mxu1 %vm238_vm1, %v6578_v61  ;;  %5015 = vmatprep.mubr.msk.f32.mxu0 %vm238_vm1, %v6154_v1 }
  0xed   : > { %4792 = vmatmul.mubr.msk.f32.gmra.mrb[12].mxu1 %vm238_vm1, %v6579_v8  ;;  %5016 = vmatmul.mubr.msk.f32.gmra.mrb[28].mxu0 %vm238_vm1, %v6165_v14 }
  0xee   : > { %4794 = vmatprep.mubr.msk.f32.mxu1 %vm238_vm1, %v5843_v59  ;;  %5018 = vmatprep.mubr.msk.f32.mxu0 %vm238_vm1, %v4217_v18 }
  0xf1   : > { %4795 = vmatmul.mubr.msk.f32.gmra.mrb[14].mxu1 %vm238_vm1, %v6580_v3  ;;  %5019 = vmatmul.mubr.msk.f32.gmra.mrb[30].mxu0 %vm238_vm1, %v4218_v23 }
  0xf2   : > { %4797 = vmatprep.mubr.msk.f32.mxu1 %vm238_vm1, %v5857_v29  ;;  %5023 = vmatprep.mubr.msk.f32.mxu0 %vm238_vm1, %v5535_v27  ;;  %v6582_v27 = vld [vmem:[#allocation29_spill] sm:$0xff] }
  0xf3   : > { %v4283_v29 = vld [vmem:[%s5402_s25 + $0x19a] sm:$0xff] }
  0xf5   : > { %4798 = vmatmul.mubr.msk.f32.gmra.mrb[16].mxu1 %vm238_vm1, %v5873_v31  ;;  %5024 = vmatmul.mubr.msk.f32.vlgmr.msra.gmra.mrb[0].mxu0 %vm238_vm1, %v5553_v30  ;;  %v6583_v30 = vld [vmem:[#allocation14_spill] sm:$0xff]  ;;  %v6584_v31 = vld [vmem:[#allocation31_spill] sm:$0xff] }
  0xf6   : > { %4800 = vmatprep.mubr.msk.f32.mxu1 %vm238_vm1, %v5878_v0  ;;  %5026 = vmatprep.mubr.msk.f32.mxu0 %vm238_vm1, %v5561_v32  ;;  %v4284_v32 = vld [vmem:[%s5402_s25 + $0x1a2] sm:$0xff] }
  0xf9   : > { %4801 = vmatmul.mubr.msk.f32.gmra.mrb[18].mxu1 %vm238_vm1, %v5891_v28  ;;  %5027 = vmatmul.mubr.msk.f32.gmra.mrb[2].mxu0 %vm238_vm1, %v5577_v34 }
  0xfa   : > { %4803 = vmatprep.mubr.msk.f32.mxu1 %vm238_vm1, %v5894_v5  ;;  %5029 = vmatprep.mubr.msk.f32.mxu0 %vm238_vm1, %v5583_v36 }
  0xfd   : > { %4804 = vmatmul.mubr.msk.f32.gmra.mrb[20].mxu1 %vm238_vm1, %v5905_v7  ;;  %5030 = vmatmul.mubr.msk.f32.gmra.mrb[4].mxu0 %vm238_vm1, %v5597_v38 }
  0xfe   : > { %4806 = vmatprep.mubr.msk.f32.mxu1 %vm238_vm1, %v5908_v10  ;;  %5032 = vmatprep.mubr.msk.f32.mxu0 %vm238_vm1, %v5603_v40 }
 0x101   : > { %4807 = vmatmul.mubr.msk.f32.gmra.mrb[22].mxu1 %vm238_vm1, %v5919_v57  ;;  %5033 = vmatmul.mubr.msk.f32.gmra.mrb[6].mxu0 %vm238_vm1, %v5617_v42 }
 0x102   : > { %4809 = vmatprep.mubr.msk.f32.mxu1 %vm238_vm1, %v5922_v51  ;;  %5035 = vmatprep.mubr.msk.f32.mxu0 %vm238_vm1, %v5623_v44 }
 0x105   : > { %4810 = vmatmul.mubr.msk.f32.gmra.mrb[24].mxu1 %vm238_vm1, %v5933_v47  ;;  %5036 = vmatmul.mubr.msk.f32.gmra.mrb[8].mxu0 %vm238_vm1, %v5637_v46 }
 0x106   : > { %4812 = vmatprep.mubr.msk.f32.mxu1 %vm238_vm1, %v5936_v43  ;;  %5038 = vmatprep.mubr.msk.f32.mxu0 %vm238_vm1, %v5643_v48 }
 0x109   : > { %4813 = vmatmul.mubr.msk.f32.gmra.mrb[26].mxu1 %vm238_vm1, %v5947_v39  ;;  %5039 = vmatmul.mubr.msk.f32.gmra.mrb[10].mxu0 %vm238_vm1, %v5657_v50 }
 0x10a   : > { %4815 = vmatprep.mubr.msk.f32.mxu1 %vm238_vm1, %v5950_v35  ;;  %5041 = vmatprep.mubr.msk.f32.mxu0 %vm238_vm1, %v5663_v52  ;;  %v6322_v52 = vld [vmem:[%s6474_s2] ss:$0 sm:$0xff] }
 0x10d   : > { %4816 = vmatmul.mubr.msk.f32.gmra.mrb[28].mxu1 %vm238_vm1, %v5961_v62  ;;  %5042 = vmatmul.mubr.msk.f32.gmra.mrb[12].mxu0 %vm238_vm1, %v5677_v54 }
 0x10e   : > { %4818 = vmatprep.mubr.msk.f32.mxu1 %vm238_vm1, %v6016_v24  ;;  %5044 = vmatprep.mubr.msk.f32.mxu0 %vm238_vm1, %v5681_v56  ;;  %v6327_v56 = vld [vmem:[%s6474_s2 + $0x1] ss:$0 sm:$0xff] }
 0x111   : > { %4819 = vmatmul.mubr.msk.f32.gmra.mrb[30].mxu1 %vm238_vm1, %v6027_v25  ;;  %5045 = vmatmul.mubr.msk.f32.gmra.mrb[14].mxu0 %vm238_vm1, %v5692_v58 }
 0x112   : > { %4847 = vmatprep.mubr.msk.f32.mxu1 %vm238_vm1, %v5532_v26  ;;  %5047 = vmatprep.mubr.msk.f32.mxu0 %vm238_vm1, %v5698_v60  ;;  %v6581_v26 = vld [vmem:[#allocation27_spill] sm:$0xff] }
 0x115   : > { %4848 = vmatmul.mubr.msk.f32.vlgmr.msra.gmra.mrb[16].mxu1 %vm238_vm1, %v6553_v11  ;;  %5048 = vmatmul.mubr.msk.f32.gmra.mrb[16].mxu0 %vm238_vm1, %v5716_v63 }
 0x116   : > { %4850 = vmatprep.mubr.msk.f32.mxu1 %vm238_vm1, %v6555_v13  ;;  %5050 = vmatprep.mubr.msk.f32.mxu0 %vm238_vm1, %v5724_v2 }
 0x119   : > { %4851 = vmatmul.mubr.msk.f32.gmra.mrb[18].mxu1 %vm238_vm1, %v6557_v15  ;;  %5051 = vmatmul.mubr.msk.f32.gmra.mrb[18].mxu0 %vm238_vm1, %v5740_v4 }
 0x11a   : > { %4853 = vmatprep.mubr.msk.f32.mxu1 %vm238_vm1, %v6559_v17  ;;  %5053 = vmatprep.mubr.msk.f32.mxu0 %vm238_vm1, %v5746_v6 }
 0x11d   : > { %4854 = vmatmul.mubr.msk.f32.gmra.mrb[20].mxu1 %vm238_vm1, %v6561_v19  ;;  %5054 = vmatmul.mubr.msk.f32.gmra.mrb[20].mxu0 %vm238_vm1, %v5760_v9 }
 0x11e   : > { %4856 = vmatprep.mubr.msk.f32.mxu1 %vm238_vm1, %v6563_v21  ;;  %5056 = vmatprep.mubr.msk.f32.mxu0 %vm238_vm1, %v5766_v55 }
 0x121   : > { %4857 = vmatmul.mubr.msk.f32.gmra.mrb[22].mxu1 %vm238_vm1, %v6565_v22  ;;  %5057 = vmatmul.mubr.msk.f32.gmra.mrb[22].mxu0 %vm238_vm1, %v5780_v53 }
 0x122   : > { %4859 = vmatprep.mubr.msk.f32.mxu1 %vm238_vm1, %v6567_v37  ;;  %5059 = vmatprep.mubr.msk.f32.mxu0 %vm238_vm1, %v5786_v49 }
 0x125   : > { %4860 = vmatmul.mubr.msk.f32.gmra.mrb[24].mxu1 %vm238_vm1, %v6569_v33  ;;  %5060 = vmatmul.mubr.msk.f32.gmra.mrb[24].mxu0 %vm238_vm1, %v5800_v45 }
 0x126   : > { %4862 = vmatprep.mubr.msk.f32.mxu1 %vm238_vm1, %v6571_v12  ;;  %5062 = vmatprep.mubr.msk.f32.mxu0 %vm238_vm1, %v5806_v41 }
 0x129   : > { %4863 = vmatmul.mubr.msk.f32.gmra.mrb[26].mxu1 %vm238_vm1, %v6573_v16  ;;  %5063 = vmatmul.mubr.msk.f32.gmra.mrb[26].mxu0 %vm238_vm1, %v6581_v26 }
 0x12a   : > { %4865 = vmatprep.mubr.msk.f32.mxu1 %vm238_vm1, %v6575_v20  ;;  %5065 = vmatprep.mubr.msk.f32.mxu0 %vm238_vm1, %v6582_v27 }
 0x12d   : > { %4866 = vmatmul.mubr.msk.f32.gmra.mrb[28].mxu1 %vm238_vm1, %v6583_v30  ;;  %5066 = vmatmul.mubr.msk.f32.gmra.mrb[28].mxu0 %vm238_vm1, %v6584_v31 }
 0x12e   : > { %4868 = vmatprep.mubr.msk.f32.mxu1 %vm238_vm1, %v6154_v1  ;;  %5068 = vmatprep.mubr.msk.f32.mxu0 %vm238_vm1, %v4283_v29 }
 0x131   : > { %4869 = vmatmul.mubr.msk.f32.gmra.mrb[30].mxu1 %vm238_vm1, %v6165_v14  ;;  %5069 = vmatmul.mubr.msk.f32.gmra.mrb[30].mxu0 %vm238_vm1, %v4284_v32 }
 0x1a8   : > { %v4775_v34 = vpop.f32.mrb[0].mxu1 }
 0x1a9   : > { %v1478_v35 = vpop.f32.mrb[1].mxu1 }
 0x1ac   : > { %v4778_v36 = vpop.f32.mrb[2].mxu1 }
 0x1ad   : > { %v1488_v38 = vpop.f32.mrb[3].mxu1 }
 0x1b0   : > { %v4781_v39 = vpop.f32.mrb[4].mxu1 }
 0x1b1   : > { %v1498_v40 = vpop.f32.mrb[5].mxu1 }
 0x1b4   : > { %v4784_v41 = vpop.f32.mrb[6].mxu1 }
 0x1b5   : > { %v1508_v42 = vpop.f32.mrb[7].mxu1 }
 0x1b8   : > { %v4787_v43 = vpop.f32.mrb[8].mxu1 }
 0x1b9   : > { %v1518_v44 = vpop.f32.mrb[9].mxu1 }
 0x1bc   : > { %v6307_v45 = vpop.f32.mrb[10].mxu1 }
 0x1bd   : > { %v6309_v46 = vpop.f32.mrb[11].mxu1 }
 0x1c0   : > { %v6311_v47 = vpop.f32.mrb[12].mxu1 }
 0x1c1   : > { %v6313_v48 = vpop.f32.mrb[13].mxu1 }
 0x1c4   : > { %v6315_v49 = vpop.f32.mrb[14].mxu1 }
 0x1c5   : > { %v6317_v50 = vpop.f32.mrb[15].mxu1 }
 0x1c8   : > { %v5025_v51 = vpop.f32.mrb[0].mxu0 }
 0x1c9   : > { %v5073_v53 = vadd.f32 %v5025_v51, %v4775_v34  ;;  %v3429_v54 = vpop.f32.mrb[1].mxu0 }
 0x1ca   : > { %v5074_v58 = vadd.f32 %v3429_v54, %v1478_v35 }
 0x1cb   : > { %v3627_v59 = vmul.f32 %v5073_v53, %v6322_v52 }
 0x1cc   : > { %v3626_v60 = vmul.f32 %v5074_v58, %v6322_v52  ;;  %v5028_v62 = vpop.f32.mrb[2].mxu0 }
 0x1cd   : > { %v3663_v63 = vadd.f32 %v6327_v56, %v3627_v59  ;;  %v5075_v0 = vadd.f32 %v5028_v62, %v4778_v36  ;;  %v3439_v2 = vpop.f32.mrb[3].mxu0 }
 0x1ce   : > { %v3662_v4 = vadd.f32 %v6327_v56, %v3626_v60  ;;  %v5076_v5 = vadd.f32 %v3439_v2, %v1488_v38 }
 0x1cf   : > { %v3695_v6 = vmax.f32 %v3663_v63, 0.0  ;;  %v3629_v7 = vmul.f32 %v5075_v0, %v6322_v52 }
 0x1d0   : > { %v3694_v9 = vmax.f32 %v3662_v4, 0.0  ;;  %v3628_v10 = vmul.f32 %v5076_v5, %v6322_v52  ;;  %v5031_v55 = vpop.f32.mrb[4].mxu0 }
 0x1d1   : > { %3728 = vst.msk [vmem:[%s6336_s18 + $0x8] sm:$0xff] %vm3726_vm2, %v3695_v6  ;;  %v3665_v57 = vadd.f32 %v6327_v56, %v3629_v7  ;;  %v5077_v28 = vadd.f32 %v5031_v55, %v4781_v39  ;;  %v3449_v24 = vpop.f32.mrb[5].mxu0 }
 0x1d2   : > { %3727 = vst.msk [vmem:[%s6336_s18] sm:$0xff] %vm3726_vm2, %v3694_v9  ;;  %v3664_v25 = vadd.f32 %v6327_v56, %v3628_v10  ;;  %v5078_v8 = vadd.f32 %v3449_v24, %v1498_v40 }
 0x1d3   : > { %v3697_v11 = vmax.f32 %v3665_v57, 0.0  ;;  %v3631_v13 = vmul.f32 %v5077_v28, %v6322_v52 }
 0x1d4   : > { %v3696_v15 = vmax.f32 %v3664_v25, 0.0  ;;  %v3630_v17 = vmul.f32 %v5078_v8, %v6322_v52  ;;  %v5034_v19 = vpop.f32.mrb[6].mxu0 }
 0x1d5   : > { %3730 = vst.msk [vmem:[%s6336_s18 + $0x18] sm:$0xff] %vm3726_vm2, %v3697_v11  ;;  %v3667_v21 = vadd.f32 %v6327_v56, %v3631_v13  ;;  %v5079_v22 = vadd.f32 %v5034_v19, %v4784_v41  ;;  %v3459_v37 = vpop.f32.mrb[7].mxu0 }
 0x1d6   : > { %3729 = vst.msk [vmem:[%s6336_s18 + $0x10] sm:$0xff] %vm3726_vm2, %v3696_v15  ;;  %v3666_v33 = vadd.f32 %v6327_v56, %v3630_v17  ;;  %v5080_v12 = vadd.f32 %v3459_v37, %v1508_v42 }
 0x1d7   : > { %v3699_v16 = vmax.f32 %v3667_v21, 0.0  ;;  %v3633_v20 = vmul.f32 %v5079_v22, %v6322_v52 }
 0x1d8   : > { %v3698_v1 = vmax.f32 %v3666_v33, 0.0  ;;  %v3632_v3 = vmul.f32 %v5080_v12, %v6322_v52  ;;  %v5037_v61 = vpop.f32.mrb[8].mxu0 }
 0x1d9   : > { %3732 = vst.msk [vmem:[%s6336_s18 + $0x28] sm:$0xff] %vm3726_vm2, %v3699_v16  ;;  %v3669_v14 = vadd.f32 %v6327_v56, %v3633_v20  ;;  %v5081_v18 = vadd.f32 %v5037_v61, %v4787_v43  ;;  %v3469_v23 = vpop.f32.mrb[9].mxu0 }
 0x1da   : > { %3731 = vst.msk [vmem:[%s6336_s18 + $0x20] sm:$0xff] %vm3726_vm2, %v3698_v1  ;;  %v3668_v26 = vadd.f32 %v6327_v56, %v3632_v3  ;;  %v5082_v27 = vadd.f32 %v3469_v23, %v1518_v44 }
 0x1db   : > { %v3701_v29 = vmax.f32 %v3669_v14, 0.0  ;;  %v3635_v30 = vmul.f32 %v5081_v18, %v6322_v52 }
 0x1dc   : > { %v3700_v31 = vmax.f32 %v3668_v26, 0.0  ;;  %v3634_v32 = vmul.f32 %v5082_v27, %v6322_v52  ;;  %v5040_v34 = vpop.f32.mrb[10].mxu0 }
 0x1dd   : > { %3734 = vst.msk [vmem:[%s6336_s18 + $0x38] sm:$0xff] %vm3726_vm2, %v3701_v29  ;;  %v3671_v35 = vadd.f32 %v6327_v56, %v3635_v30  ;;  %v5083_v36 = vadd.f32 %v5040_v34, %v6307_v45  ;;  %v3479_v38 = vpop.f32.mrb[11].mxu0 }
 0x1de   : > { %3733 = vst.msk [vmem:[%s6336_s18 + $0x30] sm:$0xff] %vm3726_vm2, %v3700_v31  ;;  %v3670_v39 = vadd.f32 %v6327_v56, %v3634_v32  ;;  %v5084_v40 = vadd.f32 %v3479_v38, %v6309_v46 }
 0x1df   : > { %v3703_v41 = vmax.f32 %v3671_v35, 0.0  ;;  %v3637_v42 = vmul.f32 %v5083_v36, %v6322_v52 }
 0x1e0   : > { %v3702_v43 = vmax.f32 %v3670_v39, 0.0  ;;  %v3636_v44 = vmul.f32 %v5084_v40, %v6322_v52  ;;  %v5043_v51 = vpop.f32.mrb[12].mxu0 }
 0x1e1   : > { %3736 = vst.msk [vmem:[%s6336_s18 + $0x48] sm:$0xff] %vm3726_vm2, %v3703_v41  ;;  %v3673_v45 = vadd.f32 %v6327_v56, %v3637_v42  ;;  %v5085_v53 = vadd.f32 %v5043_v51, %v6311_v47  ;;  %v3489_v54 = vpop.f32.mrb[13].mxu0 }
 0x1e2   : > { %3735 = vst.msk [vmem:[%s6336_s18 + $0x40] sm:$0xff] %vm3726_vm2, %v3702_v43  ;;  %v3672_v46 = vadd.f32 %v6327_v56, %v3636_v44  ;;  %v5086_v58 = vadd.f32 %v3489_v54, %v6313_v48 }
 0x1e3   : > { %v3705_v59 = vmax.f32 %v3673_v45, 0.0  ;;  %v3639_v60 = vmul.f32 %v5085_v53, %v6322_v52 }
 0x1e4   : > { %v3704_v62 = vmax.f32 %v3672_v46, 0.0  ;;  %v3638_v63 = vmul.f32 %v5086_v58, %v6322_v52  ;;  %v5046_v0 = vpop.f32.mrb[14].mxu0 }
 0x1e5   : > { %3738 = vst.msk [vmem:[%s6336_s18 + $0x58] sm:$0xff] %vm3726_vm2, %v3705_v59  ;;  %v3675_v2 = vadd.f32 %v6327_v56, %v3639_v60  ;;  %v5087_v47 = vadd.f32 %v5046_v0, %v6315_v49  ;;  %v3499_v4 = vpop.f32.mrb[15].mxu0 }
 0x1e6   : > { %3737 = vst.msk [vmem:[%s6336_s18 + $0x50] sm:$0xff] %vm3726_vm2, %v3704_v62  ;;  %v3674_v48 = vadd.f32 %v6327_v56, %v3638_v63  ;;  %v5088_v5 = vadd.f32 %v3499_v4, %v6317_v50 }
 0x1e7   : > { %v3707_v6 = vmax.f32 %v3675_v2, 0.0  ;;  %v3641_v7 = vmul.f32 %v5087_v47, %v6322_v52 }
 0x1e8   : > { %v3706_v9 = vmax.f32 %v3674_v48, 0.0  ;;  %v3640_v10 = vmul.f32 %v5088_v5, %v6322_v52  ;;  %v4849_v55 = vpop.f32.mrb[16].mxu1  ;;  %v5049_v57 = vpop.f32.mrb[16].mxu0 }
 0x1e9   : > { %3740 = vst.msk [vmem:[%s6336_s18 + $0x68] sm:$0xff] %vm3726_vm2, %v3707_v6  ;;  %v3677_v49 = vadd.f32 %v6327_v56, %v3641_v7  ;;  %v5089_v28 = vadd.f32 %v5049_v57, %v4849_v55  ;;  %v1948_v24 = vpop.f32.mrb[17].mxu1  ;;  %v3509_v25 = vpop.f32.mrb[17].mxu0 }
 0x1ea   : > { %3739 = vst.msk [vmem:[%s6336_s18 + $0x60] sm:$0xff] %vm3726_vm2, %v3706_v9  ;;  %v3676_v50 = vadd.f32 %v6327_v56, %v3640_v10  ;;  %v5090_v8 = vadd.f32 %v3509_v25, %v1948_v24 }
 0x1eb   : > { %v3709_v11 = vmax.f32 %v3677_v49, 0.0  ;;  %v3643_v13 = vmul.f32 %v5089_v28, %v6322_v52 }
 0x1ec   : > { %v3708_v15 = vmax.f32 %v3676_v50, 0.0  ;;  %v3642_v17 = vmul.f32 %v5090_v8, %v6322_v52  ;;  %v4852_v19 = vpop.f32.mrb[18].mxu1  ;;  %v5052_v21 = vpop.f32.mrb[18].mxu0 }
 0x1ed   : > { %3742 = vst.msk [vmem:[%s6336_s18 + $0x78] sm:$0xff] %vm3726_vm2, %v3709_v11  ;;  %v3679_v22 = vadd.f32 %v6327_v56, %v3643_v13  ;;  %v5091_v37 = vadd.f32 %v5052_v21, %v4852_v19  ;;  %v1958_v33 = vpop.f32.mrb[19].mxu1  ;;  %v3519_v12 = vpop.f32.mrb[19].mxu0 }
 0x1ee   : > { %3741 = vst.msk [vmem:[%s6336_s18 + $0x70] sm:$0xff] %vm3726_vm2, %v3708_v15  ;;  %v3678_v16 = vadd.f32 %v6327_v56, %v3642_v17  ;;  %v5092_v20 = vadd.f32 %v3519_v12, %v1958_v33 }
 0x1ef   : > { %v3711_v1 = vmax.f32 %v3679_v22, 0.0  ;;  %v3645_v3 = vmul.f32 %v5091_v37, %v6322_v52 }
 0x1f0   : > { %v3710_v61 = vmax.f32 %v3678_v16, 0.0  ;;  %v3644_v14 = vmul.f32 %v5092_v20, %v6322_v52  ;;  %v4855_v18 = vpop.f32.mrb[20].mxu1  ;;  %v5055_v23 = vpop.f32.mrb[20].mxu0 }
 0x1f1   : > { %3744 = vst.msk [vmem:[%s6336_s18 + $0x88] sm:$0xff] %vm3726_vm2, %v3711_v1  ;;  %v3681_v26 = vadd.f32 %v6327_v56, %v3645_v3  ;;  %v5093_v27 = vadd.f32 %v5055_v23, %v4855_v18  ;;  %v1968_v29 = vpop.f32.mrb[21].mxu1  ;;  %v3529_v30 = vpop.f32.mrb[21].mxu0 }
 0x1f2   : > { %3743 = vst.msk [vmem:[%s6336_s18 + $0x80] sm:$0xff] %vm3726_vm2, %v3710_v61  ;;  %v3680_v31 = vadd.f32 %v6327_v56, %v3644_v14  ;;  %v5094_v32 = vadd.f32 %v3529_v30, %v1968_v29 }
 0x1f3   : > { %v3713_v34 = vmax.f32 %v3681_v26, 0.0  ;;  %v3647_v35 = vmul.f32 %v5093_v27, %v6322_v52 }
 0x1f4   : > { %v3712_v36 = vmax.f32 %v3680_v31, 0.0  ;;  %v3646_v38 = vmul.f32 %v5094_v32, %v6322_v52  ;;  %v4858_v39 = vpop.f32.mrb[22].mxu1  ;;  %v5058_v40 = vpop.f32.mrb[22].mxu0 }
 0x1f5   : > { %3746 = vst.msk [vmem:[%s6336_s18 + $0x98] sm:$0xff] %vm3726_vm2, %v3713_v34  ;;  %v3683_v41 = vadd.f32 %v6327_v56, %v3647_v35  ;;  %v5095_v42 = vadd.f32 %v5058_v40, %v4858_v39  ;;  %v1978_v43 = vpop.f32.mrb[23].mxu1  ;;  %v3539_v44 = vpop.f32.mrb[23].mxu0 }
 0x1f6   : > { %3745 = vst.msk [vmem:[%s6336_s18 + $0x90] sm:$0xff] %vm3726_vm2, %v3712_v36  ;;  %v3682_v51 = vadd.f32 %v6327_v56, %v3646_v38  ;;  %v5096_v45 = vadd.f32 %v3539_v44, %v1978_v43 }
 0x1f7   : > { %v3715_v53 = vmax.f32 %v3683_v41, 0.0  ;;  %v3649_v54 = vmul.f32 %v5095_v42, %v6322_v52 }
 0x1f8   : > { %v3714_v46 = vmax.f32 %v3682_v51, 0.0  ;;  %v3648_v58 = vmul.f32 %v5096_v45, %v6322_v52  ;;  %v4861_v59 = vpop.f32.mrb[24].mxu1  ;;  %v5061_v60 = vpop.f32.mrb[24].mxu0 }
 0x1f9   : > { %3748 = vst.msk [vmem:[%s6336_s18 + $0xa8] sm:$0xff] %vm3726_vm2, %v3715_v53  ;;  %v3685_v62 = vadd.f32 %v6327_v56, %v3649_v54  ;;  %v5097_v63 = vadd.f32 %v5061_v60, %v4861_v59  ;;  %v1988_v0 = vpop.f32.mrb[25].mxu1  ;;  %v3549_v2 = vpop.f32.mrb[25].mxu0 }
 0x1fa   : > { %3747 = vst.msk [vmem:[%s6336_s18 + $0xa0] sm:$0xff] %vm3726_vm2, %v3714_v46  ;;  %v3684_v47 = vadd.f32 %v6327_v56, %v3648_v58  ;;  %v5098_v4 = vadd.f32 %v3549_v2, %v1988_v0 }
 0x1fb   : > { %v3717_v48 = vmax.f32 %v3685_v62, 0.0  ;;  %v3651_v5 = vmul.f32 %v5097_v63, %v6322_v52 }
 0x1fc   : > { %v3716_v6 = vmax.f32 %v3684_v47, 0.0  ;;  %v3650_v7 = vmul.f32 %v5098_v4, %v6322_v52  ;;  %v4864_v9 = vpop.f32.mrb[26].mxu1  ;;  %v5064_v10 = vpop.f32.mrb[26].mxu0 }
 0x1fd   : > { %3750 = vst.msk [vmem:[%s6336_s18 + $0xb8] sm:$0xff] %vm3726_vm2, %v3717_v48  ;;  %v3687_v55 = vadd.f32 %v6327_v56, %v3651_v5  ;;  %v5099_v57 = vadd.f32 %v5064_v10, %v4864_v9  ;;  %v1998_v49 = vpop.f32.mrb[27].mxu1  ;;  %v3559_v28 = vpop.f32.mrb[27].mxu0 }
 0x1fe   : > { %3749 = vst.msk [vmem:[%s6336_s18 + $0xb0] sm:$0xff] %vm3726_vm2, %v3716_v6  ;;  %v3686_v24 = vadd.f32 %v6327_v56, %v3650_v7  ;;  %v5100_v25 = vadd.f32 %v3559_v28, %v1998_v49 }
 0x1ff   : > { %v3719_v50 = vmax.f32 %v3687_v55, 0.0  ;;  %v3653_v8 = vmul.f32 %v5099_v57, %v6322_v52 }
 0x200   : > { %v3718_v11 = vmax.f32 %v3686_v24, 0.0  ;;  %v3652_v13 = vmul.f32 %v5100_v25, %v6322_v52  ;;  %v4867_v15 = vpop.f32.mrb[28].mxu1  ;;  %v5067_v17 = vpop.f32.mrb[28].mxu0 }
 0x201   : > { %3752 = vst.msk [vmem:[%s6336_s18 + $0xc8] sm:$0xff] %vm3726_vm2, %v3719_v50  ;;  %v3689_v19 = vadd.f32 %v6327_v56, %v3653_v8  ;;  %v5101_v21 = vadd.f32 %v5067_v17, %v4867_v15  ;;  %v2008_v22 = vpop.f32.mrb[29].mxu1  ;;  %v3569_v37 = vpop.f32.mrb[29].mxu0 }
 0x202   : > { %3751 = vst.msk [vmem:[%s6336_s18 + $0xc0] sm:$0xff] %vm3726_vm2, %v3718_v11  ;;  %v3688_v33 = vadd.f32 %v6327_v56, %v3652_v13  ;;  %v5102_v12 = vadd.f32 %v3569_v37, %v2008_v22 }
 0x203   : > { %v3721_v16 = vmax.f32 %v3689_v19, 0.0  ;;  %v3655_v20 = vmul.f32 %v5101_v21, %v6322_v52 }
 0x204   : > { %v3720_v1 = vmax.f32 %v3688_v33, 0.0  ;;  %v3654_v3 = vmul.f32 %v5102_v12, %v6322_v52  ;;  %v4870_v61 = vpop.f32.mrb[30].mxu1  ;;  %v5070_v14 = vpop.f32.mrb[30].mxu0 }
 0x205   : > { %3754 = vst.msk [vmem:[%s6336_s18 + $0xd8] sm:$0xff] %vm3726_vm2, %v3721_v16  ;;  %v3691_v18 = vadd.f32 %v6327_v56, %v3655_v20  ;;  %v5103_v23 = vadd.f32 %v5070_v14, %v4870_v61  ;;  %v2018_v26 = vpop.f32.mrb[31].mxu1  ;;  %v3579_v27 = vpop.f32.mrb[31].mxu0 }
 0x206   : > { %3753 = vst.msk [vmem:[%s6336_s18 + $0xd0] sm:$0xff] %vm3726_vm2, %v3720_v1  ;;  %v3690_v29 = vadd.f32 %v6327_v56, %v3654_v3  ;;  %v5104_v30 = vadd.f32 %v3579_v27, %v2018_v26 }
 0x207   : > { %v3723_v31 = vmax.f32 %v3691_v18, 0.0  ;;  %v3657_v32 = vmul.f32 %v5103_v23, %v6322_v52 }
 0x208   : > { %v3722_v34 = vmax.f32 %v3690_v29, 0.0  ;;  %v3656_v35 = vmul.f32 %v5104_v30, %v6322_v52 }
 0x209   : > { %3756 = vst.msk [vmem:[%s6336_s18 + $0xe8] sm:$0xff] %vm3726_vm2, %v3723_v31  ;;  %v3693_v36 = vadd.f32 %v6327_v56, %v3657_v32 }
 0x20a   : > { %3755 = vst.msk [vmem:[%s6336_s18 + $0xe0] sm:$0xff] %vm3726_vm2, %v3722_v34  ;;  %v3692_v38 = vadd.f32 %v6327_v56, %v3656_v35 }
 0x20b   : > { %v3725_v39 = vmax.f32 %v3693_v36, 0.0 }
 0x20c   : > { %v3724_v40 = vmax.f32 %v3692_v38, 0.0 }
 0x20d   : > { %3758 = vst.msk [vmem:[%s6336_s18 + $0xf8] sm:$0xff] %vm3726_vm2, %v3725_v39 }
 0x20e   : > { %3757 = vst.msk [vmem:[%s6336_s18 + $0xf0] sm:$0xff] %vm3726_vm2, %v3724_v40 }
 0x20f PF: > { %s13_s12 = sadd.s32 1, %s5344_s12  }
 0x210   : > { %p10_p4 = scmp.ge.s32.totalorder %s13_s12, 4  }
 0x212   :  { %12 = sbr.rel (!%p10_p4) target bundleno = 1 (0x1), region = 72 }

</bundles_post_ra>
